<compile_context>
chip_gen: v5e
topology: v5e:2x2
jax: 0.10.0
libtpu: 0.0.40
codegen_flags: <defaults>
</compile_context>

<pallas_src>
import functools
import math

import jax
import jax.numpy as jnp
from jax import lax
from jax.experimental import pallas as pl
from jax.experimental.pallas import tpu as pltpu

# ---- small synthetic BERT config ----
VOCAB = 100
TYPE_VOCAB = 2
MAX_POS = 16
HIDDEN = 32
N_HEADS = 4
HEAD_DIM = HIDDEN // N_HEADS
INTERMEDIATE = 64
N_LAYERS = 2
LN_EPS = 1e-12


# ---------------- in-kernel helpers ----------------

def _layernorm(x, gamma, beta, eps):
    mean = jnp.mean(x, axis=-1, keepdims=True)
    xc = x - mean
    var = jnp.mean(xc * xc, axis=-1, keepdims=True)
    return xc * lax.rsqrt(var + eps) * gamma + beta


def _gelu(y):
    # tanh-approximate GELU (see TODO above re: exact erf GELU).
    c = math.sqrt(2.0 / math.pi)
    return 0.5 * y * (1.0 + jnp.tanh(c * (y + 0.044715 * y * y * y)))


# ---------------- fused encoder kernel ----------------

def _encoder_kernel(emb_ref, mask_ref, emb_g_ref, emb_b_ref,
                    wqkv_ref, bqkv_ref, wo_ref, bo_ref,
                    ln1_g_ref, ln1_b_ref,
                    wi_ref, bi_ref, wo2_ref, bo2_ref,
                    ln2_g_ref, ln2_b_ref,
                    pool_w_ref, pool_b_ref,
                    out_ref, h_ref, ctx_ref,
                    *, seq, n_heads, head_dim, eps):
    layer = pl.program_id(1)
    hidden = n_heads * head_dim
    scale = 1.0 / math.sqrt(head_dim)

    # -- layer 0 of each row tile: embedding LayerNorm into the resident state.
    @pl.when(layer == 0)
    def _():
        h_ref[...] = _layernorm(emb_ref[...].astype(jnp.float32),
                                emb_g_ref[...], emb_b_ref[...], eps)

    h = h_ref[...]                                   # [S, H] f32, VMEM-resident
    hb = h.astype(jnp.bfloat16)                      # bf16 MXU operand
    bias = mask_ref[...]                             # [1, S] additive mask row

    # -- fused QKV projection: one [S,H] x [H,3H] bf16 MXU matmul.
    qkv = jnp.dot(hb, wqkv_ref[...],
                  preferred_element_type=jnp.float32) + bqkv_ref[...]   # [S,3H] f32
    qkv_b = qkv.astype(jnp.bfloat16)                 # bf16 operands for QK / PV

    # -- attention: short static head loop (bounded by n_heads only; the batch
    #    axis is a grid dimension). Each head's context is written into the
    #    ctx scratch at its static lane offset; output projection is ONE
    #    [S,H]@[H,H] matmul afterwards (full contraction depth H).
    for hh in range(n_heads):
        c0 = hh * head_dim
        q = qkv_b[:, c0:c0 + head_dim]                               # [S, Dh]
        k = qkv_b[:, hidden + c0:hidden + c0 + head_dim]             # [S, Dh]
        v = qkv_b[:, 2 * hidden + c0:2 * hidden + c0 + head_dim]     # [S, Dh]
        # scores: contract the shared last dim directly (no k.T / XLU vxpose)
        s = lax.dot_general(q, k, (((1,), (1,)), ((), ())),
                            preferred_element_type=jnp.float32) * scale
        s = s + bias                                                 # [S, S]
        s = s - jnp.max(s, axis=-1, keepdims=True)
        p = jnp.exp(s)
        p = p * pl.reciprocal(jnp.sum(p, axis=-1, keepdims=True), approx=True)
        ctx_ref[:, c0:c0 + head_dim] = jnp.dot(
            p.astype(jnp.bfloat16), v,
            preferred_element_type=jnp.float32).astype(jnp.bfloat16)

    attn = jnp.dot(ctx_ref[...], wo_ref[...],
                   preferred_element_type=jnp.float32) + bo_ref[...]  # [S, H]

    # -- residual + LN, FFN (+GELU), residual + LN — f32 stats, bf16 matmuls.
    h1 = _layernorm(attn + h, ln1_g_ref[...], ln1_b_ref[...], eps)
    ff = jnp.dot(h1.astype(jnp.bfloat16), wi_ref[...],
                 preferred_element_type=jnp.float32) + bi_ref[...]
    ff = _gelu(ff)
    ff = jnp.dot(ff.astype(jnp.bfloat16), wo2_ref[...],
                 preferred_element_type=jnp.float32) + bo2_ref[...]
    h2 = _layernorm(ff + h1, ln2_g_ref[...], ln2_b_ref[...], eps)
    h_ref[...] = h2

    # -- last layer: pooler on the CLS row only (row 0 of this row tile).
    @pl.when(layer == pl.num_programs(1) - 1)
    def _():
        cls = h2[0:1, :].astype(jnp.bfloat16)                         # [1, H]
        pooled = jnp.tanh(
            jnp.dot(cls, pool_w_ref[...],
                    preferred_element_type=jnp.float32) + pool_b_ref[...])
        out_ref[...] = pooled.astype(out_ref.dtype)                   # one dense store


# ---------------- parameters ----------------

def init_params(key):
    keys = iter(jax.random.split(key, 64))

    def nrm(shape):
        return (0.02 * jax.random.normal(next(keys), shape)).astype(jnp.float32)

    def zeros(shape):
        return jnp.zeros(shape, jnp.float32)

    def ones(shape):
        return jnp.ones(shape, jnp.float32)

    params = {
        "word_emb": nrm((VOCAB, HIDDEN)),
        "pos_emb": nrm((MAX_POS, HIDDEN)),
        "type_emb": nrm((TYPE_VOCAB, HIDDEN)),
        "emb_ln_g": ones((HIDDEN,)),
        "emb_ln_b": zeros((HIDDEN,)),
        "layers": [],
        "pool_w": nrm((HIDDEN, HIDDEN)),
        "pool_b": zeros((HIDDEN,)),
    }
    for _ in range(N_LAYERS):
        params["layers"].append({
            "wq": nrm((HIDDEN, HIDDEN)), "bq": zeros((HIDDEN,)),
            "wk": nrm((HIDDEN, HIDDEN)), "bk": zeros((HIDDEN,)),
            "wv": nrm((HIDDEN, HIDDEN)), "bv": zeros((HIDDEN,)),
            "wo": nrm((HIDDEN, HIDDEN)), "bo": zeros((HIDDEN,)),
            "ln1_g": ones((HIDDEN,)), "ln1_b": zeros((HIDDEN,)),
            "wi": nrm((HIDDEN, INTERMEDIATE)), "bi": zeros((INTERMEDIATE,)),
            "wo2": nrm((INTERMEDIATE, HIDDEN)), "bo2": zeros((HIDDEN,)),
            "ln2_g": ones((HIDDEN,)), "ln2_b": zeros((HIDDEN,)),
        })
    return params


# ---------------- forward ----------------

def bert_forward(params, input_ids, token_type_ids, attention_mask):
    B, S = input_ids.shape
    N = B * S
    layers = params["layers"]
    L = len(layers)

    # Embedding gathers are data-dependent lookups -> plain XLA glue; the
    # Pallas kernel starts from the summed embeddings (LN runs at layer 0).
    we = params["word_emb"][input_ids]                       # [B,S,H]
    pe = params["pos_emb"][:S][None, :, :]                   # [1,S,H]
    te = params["type_emb"][token_type_ids]                  # [B,S,H]
    emb = (we + pe + te).reshape(N, HIDDEN)

    # HF-style additive mask, kept as a [B,1,S] row and streamed per row tile.
    mask_add = ((1.0 - attention_mask.astype(jnp.float32)) * -10000.0)[:, None, :]

    # Stack per-layer weights on a leading layer axis so BlockSpec streams one
    # layer's weights per grid step. Matmul weights are cast to bf16 here
    # (halves the per-layer HBM stream and feeds the bf16-native MXU);
    # biases / LN params stay f32.
    def stack2(name):                                        # -> [L, 1, X] f32
        return jnp.stack([l[name] for l in layers])[:, None, :]

    bf16 = jnp.bfloat16
    wqkv = jnp.stack([jnp.concatenate([l["wq"], l["wk"], l["wv"]], axis=1)
                      for l in layers]).astype(bf16)         # [L, H, 3H] bf16
    bqkv = jnp.stack([jnp.concatenate([l["bq"], l["bk"], l["bv"]])
                      for l in layers])[:, None, :]          # [L, 1, 3H] f32
    wo = jnp.stack([l["wo"] for l in layers]).astype(bf16)   # [L, H, H] bf16
    wi = jnp.stack([l["wi"] for l in layers]).astype(bf16)   # [L, H, I] bf16
    wo2 = jnp.stack([l["wo2"] for l in layers]).astype(bf16)  # [L, I, H] bf16
    bo, bi, bo2 = stack2("bo"), stack2("bi"), stack2("bo2")
    ln1_g, ln1_b = stack2("ln1_g"), stack2("ln1_b")
    ln2_g, ln2_b = stack2("ln2_g"), stack2("ln2_b")
    pool_w = params["pool_w"].astype(bf16)

    const2 = lambda b, l: (0, 0)          # constant 2-D blocks: fetched once
    per_tile2 = lambda b, l: (b, 0)       # per-row-tile 2-D blocks
    per_tile3 = lambda b, l: (b, 0, 0)    # per-row-tile 3-D blocks
    per_layer = lambda b, l: (l, 0, 0)    # per-layer blocks: streamed over grid

    grid_spec = pltpu.PrefetchScalarGridSpec(
        num_scalar_prefetch=0,
        grid=(B, L),   # (row tiles, layers): row axis parallel, layer axis sequential
        in_specs=[
            pl.BlockSpec((S, HIDDEN), per_tile2),                   # emb tile
            pl.BlockSpec((None, 1, S), per_tile3),                  # additive mask row
            pl.BlockSpec((1, HIDDEN), const2),                      # emb_ln_g
            pl.BlockSpec((1, HIDDEN), const2),                      # emb_ln_b
            pl.BlockSpec((None, HIDDEN, 3 * HIDDEN), per_layer),    # wqkv (bf16)
            pl.BlockSpec((None, 1, 3 * HIDDEN), per_layer),         # bqkv
            pl.BlockSpec((None, HIDDEN, HIDDEN), per_layer),        # wo (bf16)
            pl.BlockSpec((None, 1, HIDDEN), per_layer),             # bo
            pl.BlockSpec((None, 1, HIDDEN), per_layer),             # ln1_g
            pl.BlockSpec((None, 1, HIDDEN), per_layer),             # ln1_b
            pl.BlockSpec((None, HIDDEN, INTERMEDIATE), per_layer),  # wi (bf16)
            pl.BlockSpec((None, 1, INTERMEDIATE), per_layer),       # bi
            pl.BlockSpec((None, INTERMEDIATE, HIDDEN), per_layer),  # wo2 (bf16)
            pl.BlockSpec((None, 1, HIDDEN), per_layer),             # bo2
            pl.BlockSpec((None, 1, HIDDEN), per_layer),             # ln2_g
            pl.BlockSpec((None, 1, HIDDEN), per_layer),             # ln2_b
            pl.BlockSpec((HIDDEN, HIDDEN), const2),                 # pool_w (bf16)
            pl.BlockSpec((1, HIDDEN), const2),                      # pool_b
        ],
        out_specs=pl.BlockSpec((None, 1, HIDDEN), per_tile3),       # pooled CLS row per tile
        scratch_shapes=[
            pltpu.VMEM((S, HIDDEN), jnp.float32),    # resident hidden state (per row tile)
            pltpu.VMEM((S, HIDDEN), jnp.bfloat16),   # assembled per-head context
        ],
    )

    kernel = functools.partial(_encoder_kernel, seq=S,
                               n_heads=N_HEADS, head_dim=HEAD_DIM, eps=LN_EPS)

    pooled = pl.pallas_call(
        kernel,
        out_shape=jax.ShapeDtypeStruct((B, 1, HIDDEN), jnp.float32),
        grid_spec=grid_spec,
        compiler_params=pltpu.CompilerParams(
            # row-tile axis shards across TensorCores (v7x megacore);
            # layer axis is a sequential dependency chain.
            dimension_semantics=("parallel", "arbitrary"),
            # explicit VMEM budget hook (at real BERT sizes this is sized to
            # row_tile + double-buffered bf16 weight set per generation).
            vmem_limit_bytes=64 * 1024 * 1024),
    )(emb, mask_add,
      params["emb_ln_g"].reshape(1, HIDDEN), params["emb_ln_b"].reshape(1, HIDDEN),
      wqkv, bqkv, wo, bo, ln1_g, ln1_b, wi, bi, wo2, bo2, ln2_g, ln2_b,
      pool_w, params["pool_b"].reshape(1, HIDDEN))

    return pooled.reshape(B, HIDDEN)


if __name__ == "__main__":
    B, S = 2, 8
    key = jax.random.PRNGKey(0)
    k_par, k_ids = jax.random.split(key)

    params = init_params(k_par)

    input_ids = jax.random.randint(k_ids, (B, S), 0, VOCAB, dtype=jnp.int32)
    token_type_ids = jnp.zeros((B, S), jnp.int32)
    # second sequence padded after 5 tokens (exercises masking)
    attention_mask = jnp.array([[1] * 8, [1] * 5 + [0] * 3], jnp.int32)

    fwd = jax.jit(bert_forward)
    pooled = fwd(params, input_ids, token_type_ids, attention_mask)
    pooled = jax.block_until_ready(pooled)
    assert pooled.shape == (B, HIDDEN) and pooled.dtype == jnp.float32
    assert bool(jnp.all(jnp.isfinite(pooled)))
    print("KERNEL_OK")
</pallas_src>

<mosaic_0001>
module attributes {stable_mosaic.version = 11 : i64} {
  func.func @_encoder_kernel(%arg0: i32, %arg1: i32, %arg2: memref<8x32xf32, #tpu.memory_space<vmem>>, %arg3: memref<1x1x8xf32, #tpu.memory_space<vmem>>, %arg4: memref<1x32xf32, #tpu.memory_space<vmem>>, %arg5: memref<1x32xf32, #tpu.memory_space<vmem>>, %arg6: memref<1x32x96xbf16, #tpu.memory_space<vmem>>, %arg7: memref<1x1x96xf32, #tpu.memory_space<vmem>>, %arg8: memref<1x32x32xbf16, #tpu.memory_space<vmem>>, %arg9: memref<1x1x32xf32, #tpu.memory_space<vmem>>, %arg10: memref<1x1x32xf32, #tpu.memory_space<vmem>>, %arg11: memref<1x1x32xf32, #tpu.memory_space<vmem>>, %arg12: memref<1x32x64xbf16, #tpu.memory_space<vmem>>, %arg13: memref<1x1x64xf32, #tpu.memory_space<vmem>>, %arg14: memref<1x64x32xbf16, #tpu.memory_space<vmem>>, %arg15: memref<1x1x32xf32, #tpu.memory_space<vmem>>, %arg16: memref<1x1x32xf32, #tpu.memory_space<vmem>>, %arg17: memref<1x1x32xf32, #tpu.memory_space<vmem>>, %arg18: memref<32x32xbf16, #tpu.memory_space<vmem>>, %arg19: memref<1x32xf32, #tpu.memory_space<vmem>>, %arg20: memref<1x1x32xf32, #tpu.memory_space<vmem>>, %arg21: memref<8x32xf32, #tpu.memory_space<vmem>>, %arg22: memref<8x32xbf16, #tpu.memory_space<vmem>>) attributes {dimension_semantics = [#tpu.dimension_semantics<parallel>, #tpu.dimension_semantics<arbitrary>], iteration_bounds = array<i64: 2, 2>, scalar_prefetch = 0 : i64, scratch_operands = 2 : i64, tpu.core_type = #tpu.core_type<tc>, window_params = [{transform_indices = @transform_0, window_bounds = array<i64: 8, 32>}, {transform_indices = @transform_1, window_bounds = array<i64: 1, 1, 8>}, {pipeline_mode = #tpu.pipeline_mode<synchronous>, transform_indices = @transform_2, window_bounds = array<i64: 1, 32>}, {pipeline_mode = #tpu.pipeline_mode<synchronous>, transform_indices = @transform_3, window_bounds = array<i64: 1, 32>}, {transform_indices = @transform_4, window_bounds = array<i64: 1, 32, 96>}, {transform_indices = @transform_5, window_bounds = array<i64: 1, 1, 96>}, {transform_indices = @transform_6, window_bounds = array<i64: 1, 32, 32>}, {transform_indices = @transform_7, window_bounds = array<i64: 1, 1, 32>}, {transform_indices = @transform_8, window_bounds = array<i64: 1, 1, 32>}, {transform_indices = @transform_9, window_bounds = array<i64: 1, 1, 32>}, {transform_indices = @transform_10, window_bounds = array<i64: 1, 32, 64>}, {transform_indices = @transform_11, window_bounds = array<i64: 1, 1, 64>}, {transform_indices = @transform_12, window_bounds = array<i64: 1, 64, 32>}, {transform_indices = @transform_13, window_bounds = array<i64: 1, 1, 32>}, {transform_indices = @transform_14, window_bounds = array<i64: 1, 1, 32>}, {transform_indices = @transform_15, window_bounds = array<i64: 1, 1, 32>}, {pipeline_mode = #tpu.pipeline_mode<synchronous>, transform_indices = @transform_16, window_bounds = array<i64: 32, 32>}, {pipeline_mode = #tpu.pipeline_mode<synchronous>, transform_indices = @transform_17, window_bounds = array<i64: 1, 32>}, {transform_indices = @transform_18, window_bounds = array<i64: 1, 1, 32>}]} {
    %c0_i32 = arith.constant 0 : i32
    %0 = arith.cmpi eq, %arg1, %c0_i32 : i32
    %1 = arith.extui %0 : i1 to i32
    %c0_i32_0 = arith.constant 0 : i32
    %2 = arith.cmpi ne, %1, %c0_i32_0 : i32
    scf.if %2 {
      %c0_88 = arith.constant 0 : index
      %c0_89 = arith.constant 0 : index
      %194 = vector.load %arg2[%c0_88, %c0_89] : memref<8x32xf32, #tpu.memory_space<vmem>>, vector<8x32xf32>
      %c0_90 = arith.constant 0 : index
      %c0_91 = arith.constant 0 : index
      %195 = vector.load %arg4[%c0_90, %c0_91] : memref<1x32xf32, #tpu.memory_space<vmem>>, vector<1x32xf32>
      %c0_92 = arith.constant 0 : index
      %c0_93 = arith.constant 0 : index
      %196 = vector.load %arg5[%c0_92, %c0_93] : memref<1x32xf32, #tpu.memory_space<vmem>>, vector<1x32xf32>
      %cst_94 = arith.constant dense<0.000000e+00> : vector<8xf32>
      %197 = vector.multi_reduction <add>, %194, %cst_94 [1] : vector<8x32xf32> to vector<8xf32>
      %198 = vector.shape_cast %197 : vector<8xf32> to vector<8x1xf32>
      %cst_95 = arith.constant 3.200000e+01 : f32
      %199 = vector.broadcast %cst_95 : f32 to vector<8x1xf32>
      %200 = arith.divf %198, %199 : vector<8x1xf32>
      %201 = vector.broadcast %200 : vector<8x1xf32> to vector<8x32xf32>
      %202 = arith.subf %194, %201 : vector<8x32xf32>
      %203 = arith.mulf %202, %202 : vector<8x32xf32>
      %cst_96 = arith.constant dense<0.000000e+00> : vector<8xf32>
      %204 = vector.multi_reduction <add>, %203, %cst_96 [1] : vector<8x32xf32> to vector<8xf32>
      %205 = vector.shape_cast %204 : vector<8xf32> to vector<8x1xf32>
      %cst_97 = arith.constant 3.200000e+01 : f32
      %206 = vector.broadcast %cst_97 : f32 to vector<8x1xf32>
      %207 = arith.divf %205, %206 : vector<8x1xf32>
      %cst_98 = arith.constant 9.99999996E-13 : f32
      %208 = vector.broadcast %cst_98 : f32 to vector<8x1xf32>
      %209 = arith.addf %207, %208 : vector<8x1xf32>
      %210 = math.rsqrt %209 : vector<8x1xf32>
      %211 = vector.broadcast %210 : vector<8x1xf32> to vector<8x32xf32>
      %212 = arith.mulf %202, %211 : vector<8x32xf32>
      %213 = vector.broadcast %195 : vector<1x32xf32> to vector<8x32xf32>
      %214 = arith.mulf %212, %213 : vector<8x32xf32>
      %215 = vector.broadcast %196 : vector<1x32xf32> to vector<8x32xf32>
      %216 = arith.addf %214, %215 : vector<8x32xf32>
      %c0_99 = arith.constant 0 : index
      %c0_100 = arith.constant 0 : index
      %217 = vector.load %arg21[%c0_99, %c0_100] : memref<8x32xf32, #tpu.memory_space<vmem>>, vector<8x32xf32>
      tpu.vector_store %arg21[%c0_99, %c0_100], %216 {strides = array<i32>} : memref<8x32xf32, #tpu.memory_space<vmem>>, vector<8x32xf32>,
    } else {
    }
    %c0 = arith.constant 0 : index
    %c0_1 = arith.constant 0 : index
    %3 = vector.load %arg21[%c0, %c0_1] : memref<8x32xf32, #tpu.memory_space<vmem>>, vector<8x32xf32>
    %4 = arith.truncf %3 : vector<8x32xf32> to vector<8x32xbf16>
    %c0_2 = arith.constant 0 : index
    %c0_3 = arith.constant 0 : index
    %c0_4 = arith.constant 0 : index
    %5 = vector.load %arg3[%c0_2, %c0_3, %c0_4] : memref<1x1x8xf32, #tpu.memory_space<vmem>>, vector<1x1x8xf32>
    %6 = vector.shape_cast %5 : vector<1x1x8xf32> to vector<1x8xf32>
    %c0_5 = arith.constant 0 : index
    %c0_6 = arith.constant 0 : index
    %c0_7 = arith.constant 0 : index
    %7 = vector.load %arg6[%c0_5, %c0_6, %c0_7] : memref<1x32x96xbf16, #tpu.memory_space<vmem>>, vector<1x32x96xbf16>
    %8 = vector.shape_cast %7 : vector<1x32x96xbf16> to vector<32x96xbf16>
    %cst = arith.constant dense<0.000000e+00> : vector<8x96xf32>
    %9 = tpu.matmul %4, %8, %cst {dimension_numbers = #tpu.dot_dimension_numbers<[1], [0], [0], [1], [0, 0, 1, 1], [], []>} : vector<8x32xbf16>, vector<32x96xbf16>, vector<8x96xf32> -> vector<8x96xf32>
    %c0_8 = arith.constant 0 : index
    %c0_9 = arith.constant 0 : index
    %c0_10 = arith.constant 0 : index
    %10 = vector.load %arg7[%c0_8, %c0_9, %c0_10] : memref<1x1x96xf32, #tpu.memory_space<vmem>>, vector<1x1x96xf32>
    %11 = vector.shape_cast %10 : vector<1x1x96xf32> to vector<1x96xf32>
    %12 = vector.broadcast %11 : vector<1x96xf32> to vector<8x96xf32>
    %13 = arith.addf %9, %12 : vector<8x96xf32>
    %14 = arith.truncf %13 : vector<8x96xf32> to vector<8x96xbf16>
    %15 = vector.extract_strided_slice %14 {offsets = [0, 0], sizes = [8, 8], strides = [1, 1]} : vector<8x96xbf16> to vector<8x8xbf16>
    %16 = vector.extract_strided_slice %14 {offsets = [0, 32], sizes = [8, 8], strides = [1, 1]} : vector<8x96xbf16> to vector<8x8xbf16>
    %17 = vector.extract_strided_slice %14 {offsets = [0, 64], sizes = [8, 8], strides = [1, 1]} : vector<8x96xbf16> to vector<8x8xbf16>
    %cst_11 = arith.constant dense<0.000000e+00> : vector<8x8xf32>
    %18 = tpu.matmul %15, %16, %cst_11 {dimension_numbers = #tpu.dot_dimension_numbers<[1], [1], [0], [0], [0, 0, 1, 0], [], []>} : vector<8x8xbf16>, vector<8x8xbf16>, vector<8x8xf32> -> vector<8x8xf32>
    %cst_12 = arith.constant 0.353553385 : f32
    %19 = vector.broadcast %cst_12 : f32 to vector<8x8xf32>
    %20 = arith.mulf %18, %19 : vector<8x8xf32>
    %21 = vector.broadcast %6 : vector<1x8xf32> to vector<8x8xf32>
    %22 = arith.addf %20, %21 : vector<8x8xf32>
    %cst_13 = arith.constant dense<0xFF800000> : vector<8xf32>
    %23 = vector.multi_reduction <maximumf>, %22, %cst_13 [1] : vector<8x8xf32> to vector<8xf32>
    %24 = vector.shape_cast %23 : vector<8xf32> to vector<8x1xf32>
    %25 = vector.broadcast %24 : vector<8x1xf32> to vector<8x8xf32>
    %26 = arith.subf %22, %25 : vector<8x8xf32>
    %27 = math.exp %26 : vector<8x8xf32>
    %cst_14 = arith.constant dense<0.000000e+00> : vector<8xf32>
    %28 = vector.multi_reduction <add>, %27, %cst_14 [1] : vector<8x8xf32> to vector<8xf32>
    %29 = vector.shape_cast %28 : vector<8xf32> to vector<8x1xf32>
    %30 = tpu.reciprocal %29 {approx = true} : vector<8x1xf32> -> vector<8x1xf32>
    %31 = vector.broadcast %30 : vector<8x1xf32> to vector<8x8xf32>
    %32 = arith.mulf %27, %31 : vector<8x8xf32>
    %33 = arith.truncf %32 : vector<8x8xf32> to vector<8x8xbf16>
    %cst_15 = arith.constant dense<0.000000e+00> : vector<8x8xf32>
    %34 = tpu.matmul %33, %17, %cst_15 {dimension_numbers = #tpu.dot_dimension_numbers<[1], [0], [0], [1], [0, 0, 1, 1], [], []>} : vector<8x8xbf16>, vector<8x8xbf16>, vector<8x8xf32> -> vector<8x8xf32>
    %35 = arith.truncf %34 : vector<8x8xf32> to vector<8x8xbf16>
    %c0_16 = arith.constant 0 : index
    %c0_17 = arith.constant 0 : index
    %36 = vector.load %arg22[%c0_16, %c0_17] : memref<8x32xbf16, #tpu.memory_space<vmem>>, vector<8x8xbf16>
    tpu.vector_store %arg22[%c0_16, %c0_17], %35 {strides = array<i32>} : memref<8x32xbf16, #tpu.memory_space<vmem>>, vector<8x8xbf16>,
    %37 = vector.extract_strided_slice %14 {offsets = [0, 8], sizes = [8, 8], strides = [1, 1]} : vector<8x96xbf16> to vector<8x8xbf16>
    %38 = vector.extract_strided_slice %14 {offsets = [0, 40], sizes = [8, 8], strides = [1, 1]} : vector<8x96xbf16> to vector<8x8xbf16>
    %39 = vector.extract_strided_slice %14 {offsets = [0, 72], sizes = [8, 8], strides = [1, 1]} : vector<8x96xbf16> to vector<8x8xbf16>
    %cst_18 = arith.constant dense<0.000000e+00> : vector<8x8xf32>
    %40 = tpu.matmul %37, %38, %cst_18 {dimension_numbers = #tpu.dot_dimension_numbers<[1], [1], [0], [0], [0, 0, 1, 0], [], []>} : vector<8x8xbf16>, vector<8x8xbf16>, vector<8x8xf32> -> vector<8x8xf32>
    %cst_19 = arith.constant 0.353553385 : f32
    %41 = vector.broadcast %cst_19 : f32 to vector<8x8xf32>
    %42 = arith.mulf %40, %41 : vector<8x8xf32>
    %43 = vector.broadcast %6 : vector<1x8xf32> to vector<8x8xf32>
    %44 = arith.addf %42, %43 : vector<8x8xf32>
    %cst_20 = arith.constant dense<0xFF800000> : vector<8xf32>
    %45 = vector.multi_reduction <maximumf>, %44, %cst_20 [1] : vector<8x8xf32> to vector<8xf32>
    %46 = vector.shape_cast %45 : vector<8xf32> to vector<8x1xf32>
    %47 = vector.broadcast %46 : vector<8x1xf32> to vector<8x8xf32>
    %48 = arith.subf %44, %47 : vector<8x8xf32>
    %49 = math.exp %48 : vector<8x8xf32>
    %cst_21 = arith.constant dense<0.000000e+00> : vector<8xf32>
    %50 = vector.multi_reduction <add>, %49, %cst_21 [1] : vector<8x8xf32> to vector<8xf32>
    %51 = vector.shape_cast %50 : vector<8xf32> to vector<8x1xf32>
    %52 = tpu.reciprocal %51 {approx = true} : vector<8x1xf32> -> vector<8x1xf32>
    %53 = vector.broadcast %52 : vector<8x1xf32> to vector<8x8xf32>
    %54 = arith.mulf %49, %53 : vector<8x8xf32>
    %55 = arith.truncf %54 : vector<8x8xf32> to vector<8x8xbf16>
    %cst_22 = arith.constant dense<0.000000e+00> : vector<8x8xf32>
    %56 = tpu.matmul %55, %39, %cst_22 {dimension_numbers = #tpu.dot_dimension_numbers<[1], [0], [0], [1], [0, 0, 1, 1], [], []>} : vector<8x8xbf16>, vector<8x8xbf16>, vector<8x8xf32> -> vector<8x8xf32>
    %57 = arith.truncf %56 : vector<8x8xf32> to vector<8x8xbf16>
    %c0_23 = arith.constant 0 : index
    %c8 = arith.constant 8 : index
    %58 = vector.load %arg22[%c0_23, %c8] : memref<8x32xbf16, #tpu.memory_space<vmem>>, vector<8x8xbf16>
    tpu.vector_store %arg22[%c0_23, %c8], %57 {strides = array<i32>} : memref<8x32xbf16, #tpu.memory_space<vmem>>, vector<8x8xbf16>,
    %59 = vector.extract_strided_slice %14 {offsets = [0, 16], sizes = [8, 8], strides = [1, 1]} : vector<8x96xbf16> to vector<8x8xbf16>
    %60 = vector.extract_strided_slice %14 {offsets = [0, 48], sizes = [8, 8], strides = [1, 1]} : vector<8x96xbf16> to vector<8x8xbf16>
    %61 = vector.extract_strided_slice %14 {offsets = [0, 80], sizes = [8, 8], strides = [1, 1]} : vector<8x96xbf16> to vector<8x8xbf16>
    %cst_24 = arith.constant dense<0.000000e+00> : vector<8x8xf32>
    %62 = tpu.matmul %59, %60, %cst_24 {dimension_numbers = #tpu.dot_dimension_numbers<[1], [1], [0], [0], [0, 0, 1, 0], [], []>} : vector<8x8xbf16>, vector<8x8xbf16>, vector<8x8xf32> -> vector<8x8xf32>
    %cst_25 = arith.constant 0.353553385 : f32
    %63 = vector.broadcast %cst_25 : f32 to vector<8x8xf32>
    %64 = arith.mulf %62, %63 : vector<8x8xf32>
    %65 = vector.broadcast %6 : vector<1x8xf32> to vector<8x8xf32>
    %66 = arith.addf %64, %65 : vector<8x8xf32>
    %cst_26 = arith.constant dense<0xFF800000> : vector<8xf32>
    %67 = vector.multi_reduction <maximumf>, %66, %cst_26 [1] : vector<8x8xf32> to vector<8xf32>
    %68 = vector.shape_cast %67 : vector<8xf32> to vector<8x1xf32>
    %69 = vector.broadcast %68 : vector<8x1xf32> to vector<8x8xf32>
    %70 = arith.subf %66, %69 : vector<8x8xf32>
    %71 = math.exp %70 : vector<8x8xf32>
    %cst_27 = arith.constant dense<0.000000e+00> : vector<8xf32>
    %72 = vector.multi_reduction <add>, %71, %cst_27 [1] : vector<8x8xf32> to vector<8xf32>
    %73 = vector.shape_cast %72 : vector<8xf32> to vector<8x1xf32>
    %74 = tpu.reciprocal %73 {approx = true} : vector<8x1xf32> -> vector<8x1xf32>
    %75 = vector.broadcast %74 : vector<8x1xf32> to vector<8x8xf32>
    %76 = arith.mulf %71, %75 : vector<8x8xf32>
    %77 = arith.truncf %76 : vector<8x8xf32> to vector<8x8xbf16>
    %cst_28 = arith.constant dense<0.000000e+00> : vector<8x8xf32>
    %78 = tpu.matmul %77, %61, %cst_28 {dimension_numbers = #tpu.dot_dimension_numbers<[1], [0], [0], [1], [0, 0, 1, 1], [], []>} : vector<8x8xbf16>, vector<8x8xbf16>, vector<8x8xf32> -> vector<8x8xf32>
    %79 = arith.truncf %78 : vector<8x8xf32> to vector<8x8xbf16>
    %c0_29 = arith.constant 0 : index
    %c16 = arith.constant 16 : index
    %80 = vector.load %arg22[%c0_29, %c16] : memref<8x32xbf16, #tpu.memory_space<vmem>>, vector<8x8xbf16>
    tpu.vector_store %arg22[%c0_29, %c16], %79 {strides = array<i32>} : memref<8x32xbf16, #tpu.memory_space<vmem>>, vector<8x8xbf16>,
    %81 = vector.extract_strided_slice %14 {offsets = [0, 24], sizes = [8, 8], strides = [1, 1]} : vector<8x96xbf16> to vector<8x8xbf16>
    %82 = vector.extract_strided_slice %14 {offsets = [0, 56], sizes = [8, 8], strides = [1, 1]} : vector<8x96xbf16> to vector<8x8xbf16>
    %83 = vector.extract_strided_slice %14 {offsets = [0, 88], sizes = [8, 8], strides = [1, 1]} : vector<8x96xbf16> to vector<8x8xbf16>
    %cst_30 = arith.constant dense<0.000000e+00> : vector<8x8xf32>
    %84 = tpu.matmul %81, %82, %cst_30 {dimension_numbers = #tpu.dot_dimension_numbers<[1], [1], [0], [0], [0, 0, 1, 0], [], []>} : vector<8x8xbf16>, vector<8x8xbf16>, vector<8x8xf32> -> vector<8x8xf32>
    %cst_31 = arith.constant 0.353553385 : f32
    %85 = vector.broadcast %cst_31 : f32 to vector<8x8xf32>
    %86 = arith.mulf %84, %85 : vector<8x8xf32>
    %87 = vector.broadcast %6 : vector<1x8xf32> to vector<8x8xf32>
    %88 = arith.addf %86, %87 : vector<8x8xf32>
    %cst_32 = arith.constant dense<0xFF800000> : vector<8xf32>
    %89 = vector.multi_reduction <maximumf>, %88, %cst_32 [1] : vector<8x8xf32> to vector<8xf32>
    %90 = vector.shape_cast %89 : vector<8xf32> to vector<8x1xf32>
    %91 = vector.broadcast %90 : vector<8x1xf32> to vector<8x8xf32>
    %92 = arith.subf %88, %91 : vector<8x8xf32>
    %93 = math.exp %92 : vector<8x8xf32>
    %cst_33 = arith.constant dense<0.000000e+00> : vector<8xf32>
    %94 = vector.multi_reduction <add>, %93, %cst_33 [1] : vector<8x8xf32> to vector<8xf32>
    %95 = vector.shape_cast %94 : vector<8xf32> to vector<8x1xf32>
    %96 = tpu.reciprocal %95 {approx = true} : vector<8x1xf32> -> vector<8x1xf32>
    %97 = vector.broadcast %96 : vector<8x1xf32> to vector<8x8xf32>
    %98 = arith.mulf %93, %97 : vector<8x8xf32>
    %99 = arith.truncf %98 : vector<8x8xf32> to vector<8x8xbf16>
    %cst_34 = arith.constant dense<0.000000e+00> : vector<8x8xf32>
    %100 = tpu.matmul %99, %83, %cst_34 {dimension_numbers = #tpu.dot_dimension_numbers<[1], [0], [0], [1], [0, 0, 1, 1], [], []>} : vector<8x8xbf16>, vector<8x8xbf16>, vector<8x8xf32> -> vector<8x8xf32>
    %101 = arith.truncf %100 : vector<8x8xf32> to vector<8x8xbf16>
    %c0_35 = arith.constant 0 : index
    %c24 = arith.constant 24 : index
    %102 = vector.load %arg22[%c0_35, %c24] : memref<8x32xbf16, #tpu.memory_space<vmem>>, vector<8x8xbf16>
    tpu.vector_store %arg22[%c0_35, %c24], %101 {strides = array<i32>} : memref<8x32xbf16, #tpu.memory_space<vmem>>, vector<8x8xbf16>,
    %c0_36 = arith.constant 0 : index
    %c0_37 = arith.constant 0 : index
    %103 = vector.load %arg22[%c0_36, %c0_37] : memref<8x32xbf16, #tpu.memory_space<vmem>>, vector<8x32xbf16>
    %c0_38 = arith.constant 0 : index
    %c0_39 = arith.constant 0 : index
    %c0_40 = arith.constant 0 : index
    %104 = vector.load %arg8[%c0_38, %c0_39, %c0_40] : memref<1x32x32xbf16, #tpu.memory_space<vmem>>, vector<1x32x32xbf16>
    %105 = vector.shape_cast %104 : vector<1x32x32xbf16> to vector<32x32xbf16>
    %cst_41 = arith.constant dense<0.000000e+00> : vector<8x32xf32>
    %106 = tpu.matmul %103, %105, %cst_41 {dimension_numbers = #tpu.dot_dimension_numbers<[1], [0], [0], [1], [0, 0, 1, 1], [], []>} : vector<8x32xbf16>, vector<32x32xbf16>, vector<8x32xf32> -> vector<8x32xf32>
    %c0_42 = arith.constant 0 : index
    %c0_43 = arith.constant 0 : index
    %c0_44 = arith.constant 0 : index
    %107 = vector.load %arg9[%c0_42, %c0_43, %c0_44] : memref<1x1x32xf32, #tpu.memory_space<vmem>>, vector<1x1x32xf32>
    %108 = vector.shape_cast %107 : vector<1x1x32xf32> to vector<1x32xf32>
    %109 = vector.broadcast %108 : vector<1x32xf32> to vector<8x32xf32>
    %110 = arith.addf %106, %109 : vector<8x32xf32>
    %111 = arith.addf %110, %3 : vector<8x32xf32>
    %c0_45 = arith.constant 0 : index
    %c0_46 = arith.constant 0 : index
    %c0_47 = arith.constant 0 : index
    %112 = vector.load %arg10[%c0_45, %c0_46, %c0_47] : memref<1x1x32xf32, #tpu.memory_space<vmem>>, vector<1x1x32xf32>
    %113 = vector.shape_cast %112 : vector<1x1x32xf32> to vector<1x32xf32>
    %c0_48 = arith.constant 0 : index
    %c0_49 = arith.constant 0 : index
    %c0_50 = arith.constant 0 : index
    %114 = vector.load %arg11[%c0_48, %c0_49, %c0_50] : memref<1x1x32xf32, #tpu.memory_space<vmem>>, vector<1x1x32xf32>
    %115 = vector.shape_cast %114 : vector<1x1x32xf32> to vector<1x32xf32>
    %cst_51 = arith.constant dense<0.000000e+00> : vector<8xf32>
    %116 = vector.multi_reduction <add>, %111, %cst_51 [1] : vector<8x32xf32> to vector<8xf32>
    %117 = vector.shape_cast %116 : vector<8xf32> to vector<8x1xf32>
    %cst_52 = arith.constant 3.200000e+01 : f32
    %118 = vector.broadcast %cst_52 : f32 to vector<8x1xf32>
    %119 = arith.divf %117, %118 : vector<8x1xf32>
    %120 = vector.broadcast %119 : vector<8x1xf32> to vector<8x32xf32>
    %121 = arith.subf %111, %120 : vector<8x32xf32>
    %122 = arith.mulf %121, %121 : vector<8x32xf32>
    %cst_53 = arith.constant dense<0.000000e+00> : vector<8xf32>
    %123 = vector.multi_reduction <add>, %122, %cst_53 [1] : vector<8x32xf32> to vector<8xf32>
    %124 = vector.shape_cast %123 : vector<8xf32> to vector<8x1xf32>
    %cst_54 = arith.constant 3.200000e+01 : f32
    %125 = vector.broadcast %cst_54 : f32 to vector<8x1xf32>
    %126 = arith.divf %124, %125 : vector<8x1xf32>
    %cst_55 = arith.constant 9.99999996E-13 : f32
    %127 = vector.broadcast %cst_55 : f32 to vector<8x1xf32>
    %128 = arith.addf %126, %127 : vector<8x1xf32>
    %129 = math.rsqrt %128 : vector<8x1xf32>
    %130 = vector.broadcast %129 : vector<8x1xf32> to vector<8x32xf32>
    %131 = arith.mulf %121, %130 : vector<8x32xf32>
    %132 = vector.broadcast %113 : vector<1x32xf32> to vector<8x32xf32>
    %133 = arith.mulf %131, %132 : vector<8x32xf32>
    %134 = vector.broadcast %115 : vector<1x32xf32> to vector<8x32xf32>
    %135 = arith.addf %133, %134 : vector<8x32xf32>
    %136 = arith.truncf %135 : vector<8x32xf32> to vector<8x32xbf16>
    %c0_56 = arith.constant 0 : index
    %c0_57 = arith.constant 0 : index
    %c0_58 = arith.constant 0 : index
    %137 = vector.load %arg12[%c0_56, %c0_57, %c0_58] : memref<1x32x64xbf16, #tpu.memory_space<vmem>>, vector<1x32x64xbf16>
    %138 = vector.shape_cast %137 : vector<1x32x64xbf16> to vector<32x64xbf16>
    %cst_59 = arith.constant dense<0.000000e+00> : vector<8x64xf32>
    %139 = tpu.matmul %136, %138, %cst_59 {dimension_numbers = #tpu.dot_dimension_numbers<[1], [0], [0], [1], [0, 0, 1, 1], [], []>} : vector<8x32xbf16>, vector<32x64xbf16>, vector<8x64xf32> -> vector<8x64xf32>
    %c0_60 = arith.constant 0 : index
    %c0_61 = arith.constant 0 : index
    %c0_62 = arith.constant 0 : index
    %140 = vector.load %arg13[%c0_60, %c0_61, %c0_62] : memref<1x1x64xf32, #tpu.memory_space<vmem>>, vector<1x1x64xf32>
    %141 = vector.shape_cast %140 : vector<1x1x64xf32> to vector<1x64xf32>
    %142 = vector.broadcast %141 : vector<1x64xf32> to vector<8x64xf32>
    %143 = arith.addf %139, %142 : vector<8x64xf32>
    %cst_63 = arith.constant 5.000000e-01 : f32
    %144 = vector.broadcast %cst_63 : f32 to vector<8x64xf32>
    %145 = arith.mulf %144, %143 : vector<8x64xf32>
    %cst_64 = arith.constant 4.471500e-02 : f32
    %146 = vector.broadcast %cst_64 : f32 to vector<8x64xf32>
    %147 = arith.mulf %146, %143 : vector<8x64xf32>
    %148 = arith.mulf %147, %143 : vector<8x64xf32>
    %149 = arith.mulf %148, %143 : vector<8x64xf32>
    %150 = arith.addf %143, %149 : vector<8x64xf32>
    %cst_65 = arith.constant 0.797884583 : f32
    %151 = vector.broadcast %cst_65 : f32 to vector<8x64xf32>
    %152 = arith.mulf %151, %150 : vector<8x64xf32>
    %153 = math.tanh %152 : vector<8x64xf32>
    %cst_66 = arith.constant 1.000000e+00 : f32
    %154 = vector.broadcast %cst_66 : f32 to vector<8x64xf32>
    %155 = arith.addf %154, %153 : vector<8x64xf32>
    %156 = arith.mulf %145, %155 : vector<8x64xf32>
    %157 = arith.truncf %156 : vector<8x64xf32> to vector<8x64xbf16>
    %c0_67 = arith.constant 0 : index
    %c0_68 = arith.constant 0 : index
    %c0_69 = arith.constant 0 : index
    %158 = vector.load %arg14[%c0_67, %c0_68, %c0_69] : memref<1x64x32xbf16, #tpu.memory_space<vmem>>, vector<1x64x32xbf16>
    %159 = vector.shape_cast %158 : vector<1x64x32xbf16> to vector<64x32xbf16>
    %cst_70 = arith.constant dense<0.000000e+00> : vector<8x32xf32>
    %160 = tpu.matmul %157, %159, %cst_70 {dimension_numbers = #tpu.dot_dimension_numbers<[1], [0], [0], [1], [0, 0, 1, 1], [], []>} : vector<8x64xbf16>, vector<64x32xbf16>, vector<8x32xf32> -> vector<8x32xf32>
    %c0_71 = arith.constant 0 : index
    %c0_72 = arith.constant 0 : index
    %c0_73 = arith.constant 0 : index
    %161 = vector.load %arg15[%c0_71, %c0_72, %c0_73] : memref<1x1x32xf32, #tpu.memory_space<vmem>>, vector<1x1x32xf32>
    %162 = vector.shape_cast %161 : vector<1x1x32xf32> to vector<1x32xf32>
    %163 = vector.broadcast %162 : vector<1x32xf32> to vector<8x32xf32>
    %164 = arith.addf %160, %163 : vector<8x32xf32>
    %165 = arith.addf %164, %135 : vector<8x32xf32>
    %c0_74 = arith.constant 0 : index
    %c0_75 = arith.constant 0 : index
    %c0_76 = arith.constant 0 : index
    %166 = vector.load %arg16[%c0_74, %c0_75, %c0_76] : memref<1x1x32xf32, #tpu.memory_space<vmem>>, vector<1x1x32xf32>
    %167 = vector.shape_cast %166 : vector<1x1x32xf32> to vector<1x32xf32>
    %c0_77 = arith.constant 0 : index
    %c0_78 = arith.constant 0 : index
    %c0_79 = arith.constant 0 : index
    %168 = vector.load %arg17[%c0_77, %c0_78, %c0_79] : memref<1x1x32xf32, #tpu.memory_space<vmem>>, vector<1x1x32xf32>
    %169 = vector.shape_cast %168 : vector<1x1x32xf32> to vector<1x32xf32>
    %cst_80 = arith.constant dense<0.000000e+00> : vector<8xf32>
    %170 = vector.multi_reduction <add>, %165, %cst_80 [1] : vector<8x32xf32> to vector<8xf32>
    %171 = vector.shape_cast %170 : vector<8xf32> to vector<8x1xf32>
    %cst_81 = arith.constant 3.200000e+01 : f32
    %172 = vector.broadcast %cst_81 : f32 to vector<8x1xf32>
    %173 = arith.divf %171, %172 : vector<8x1xf32>
    %174 = vector.broadcast %173 : vector<8x1xf32> to vector<8x32xf32>
    %175 = arith.subf %165, %174 : vector<8x32xf32>
    %176 = arith.mulf %175, %175 : vector<8x32xf32>
    %cst_82 = arith.constant dense<0.000000e+00> : vector<8xf32>
    %177 = vector.multi_reduction <add>, %176, %cst_82 [1] : vector<8x32xf32> to vector<8xf32>
    %178 = vector.shape_cast %177 : vector<8xf32> to vector<8x1xf32>
    %cst_83 = arith.constant 3.200000e+01 : f32
    %179 = vector.broadcast %cst_83 : f32 to vector<8x1xf32>
    %180 = arith.divf %178, %179 : vector<8x1xf32>
    %cst_84 = arith.constant 9.99999996E-13 : f32
    %181 = vector.broadcast %cst_84 : f32 to vector<8x1xf32>
    %182 = arith.addf %180, %181 : vector<8x1xf32>
    %183 = math.rsqrt %182 : vector<8x1xf32>
    %184 = vector.broadcast %183 : vector<8x1xf32> to vector<8x32xf32>
    %185 = arith.mulf %175, %184 : vector<8x32xf32>
    %186 = vector.broadcast %167 : vector<1x32xf32> to vector<8x32xf32>
    %187 = arith.mulf %185, %186 : vector<8x32xf32>
    %188 = vector.broadcast %169 : vector<1x32xf32> to vector<8x32xf32>
    %189 = arith.addf %187, %188 : vector<8x32xf32>
    %c0_85 = arith.constant 0 : index
    %c0_86 = arith.constant 0 : index
    %190 = vector.load %arg21[%c0_85, %c0_86] : memref<8x32xf32, #tpu.memory_space<vmem>>, vector<8x32xf32>
    tpu.vector_store %arg21[%c0_85, %c0_86], %189 {strides = array<i32>} : memref<8x32xf32, #tpu.memory_space<vmem>>, vector<8x32xf32>,
    %c1_i32 = arith.constant 1 : i32
    %191 = arith.cmpi eq, %arg1, %c1_i32 : i32
    %192 = arith.extui %191 : i1 to i32
    %c0_i32_87 = arith.constant 0 : i32
    %193 = arith.cmpi ne, %192, %c0_i32_87 : i32
    scf.if %193 {
      %194 = vector.extract_strided_slice %189 {offsets = [0, 0], sizes = [1, 32], strides = [1, 1]} : vector<8x32xf32> to vector<1x32xf32>
      %195 = arith.truncf %194 : vector<1x32xf32> to vector<1x32xbf16>
      %c0_88 = arith.constant 0 : index
      %c0_89 = arith.constant 0 : index
      %196 = vector.load %arg18[%c0_88, %c0_89] : memref<32x32xbf16, #tpu.memory_space<vmem>>, vector<32x32xbf16>
      %cst_90 = arith.constant dense<0.000000e+00> : vector<1x32xf32>
      %197 = tpu.matmul %195, %196, %cst_90 {dimension_numbers = #tpu.dot_dimension_numbers<[1], [0], [0], [1], [0, 0, 1, 1], [], []>} : vector<1x32xbf16>, vector<32x32xbf16>, vector<1x32xf32> -> vector<1x32xf32>
      %c0_91 = arith.constant 0 : index
      %c0_92 = arith.constant 0 : index
      %198 = vector.load %arg19[%c0_91, %c0_92] : memref<1x32xf32, #tpu.memory_space<vmem>>, vector<1x32xf32>
      %199 = arith.addf %197, %198 : vector<1x32xf32>
      %200 = math.tanh %199 : vector<1x32xf32>
      %c0_93 = arith.constant 0 : index
      %c0_94 = arith.constant 0 : index
      %c0_95 = arith.constant 0 : index
      %201 = vector.load %arg20[%c0_93, %c0_94, %c0_95] : memref<1x1x32xf32, #tpu.memory_space<vmem>>, vector<1x1x32xf32>
      %202 = vector.shape_cast %201 : vector<1x1x32xf32> to vector<1x32xf32>
      %203 = vector.shape_cast %200 : vector<1x32xf32> to vector<1x1x32xf32>
      tpu.vector_store %arg20[%c0_93, %c0_94, %c0_95], %203 {strides = array<i32>} : memref<1x1x32xf32, #tpu.memory_space<vmem>>, vector<1x1x32xf32>,
    } else {
    }
    return
  }
  func.func @transform_0(%arg0: i32, %arg1: i32) -> (i32, i32) {
    %c0_i32 = arith.constant 0 : i32
    %c0_i32_0 = arith.constant 0 : i32
    return %arg0, %c0_i32 : i32, i32
  }
  func.func @transform_1(%arg0: i32, %arg1: i32) -> (i32, i32, i32) {
    %c0_i32 = arith.constant 0 : i32
    %c0_i32_0 = arith.constant 0 : i32
    %c0_i32_1 = arith.constant 0 : i32
    return %arg0, %c0_i32, %c0_i32_0 : i32, i32, i32
  }
  func.func @transform_2(%arg0: i32, %arg1: i32) -> (i32, i32) {
    %c0_i32 = arith.constant 0 : i32
    %c0_i32_0 = arith.constant 0 : i32
    %c0_i32_1 = arith.constant 0 : i32
    return %c0_i32, %c0_i32_0 : i32, i32
  }
  func.func @transform_3(%arg0: i32, %arg1: i32) -> (i32, i32) {
    %c0_i32 = arith.constant 0 : i32
    %c0_i32_0 = arith.constant 0 : i32
    %c0_i32_1 = arith.constant 0 : i32
    return %c0_i32, %c0_i32_0 : i32, i32
  }
  func.func @transform_4(%arg0: i32, %arg1: i32) -> (i32, i32, i32) {
    %c0_i32 = arith.constant 0 : i32
    %c0_i32_0 = arith.constant 0 : i32
    %c0_i32_1 = arith.constant 0 : i32
    return %arg1, %c0_i32, %c0_i32_0 : i32, i32, i32
  }
  func.func @transform_5(%arg0: i32, %arg1: i32) -> (i32, i32, i32) {
    %c0_i32 = arith.constant 0 : i32
    %c0_i32_0 = arith.constant 0 : i32
    %c0_i32_1 = arith.constant 0 : i32
    return %arg1, %c0_i32, %c0_i32_0 : i32, i32, i32
  }
  func.func @transform_6(%arg0: i32, %arg1: i32) -> (i32, i32, i32) {
    %c0_i32 = arith.constant 0 : i32
    %c0_i32_0 = arith.constant 0 : i32
    %c0_i32_1 = arith.constant 0 : i32
    return %arg1, %c0_i32, %c0_i32_0 : i32, i32, i32
  }
  func.func @transform_7(%arg0: i32, %arg1: i32) -> (i32, i32, i32) {
    %c0_i32 = arith.constant 0 : i32
    %c0_i32_0 = arith.constant 0 : i32
    %c0_i32_1 = arith.constant 0 : i32
    return %arg1, %c0_i32, %c0_i32_0 : i32, i32, i32
  }
  func.func @transform_8(%arg0: i32, %arg1: i32) -> (i32, i32, i32) {
    %c0_i32 = arith.constant 0 : i32
    %c0_i32_0 = arith.constant 0 : i32
    %c0_i32_1 = arith.constant 0 : i32
    return %arg1, %c0_i32, %c0_i32_0 : i32, i32, i32
  }
  func.func @transform_9(%arg0: i32, %arg1: i32) -> (i32, i32, i32) {
    %c0_i32 = arith.constant 0 : i32
    %c0_i32_0 = arith.constant 0 : i32
    %c0_i32_1 = arith.constant 0 : i32
    return %arg1, %c0_i32, %c0_i32_0 : i32, i32, i32
  }
  func.func @transform_10(%arg0: i32, %arg1: i32) -> (i32, i32, i32) {
    %c0_i32 = arith.constant 0 : i32
    %c0_i32_0 = arith.constant 0 : i32
    %c0_i32_1 = arith.constant 0 : i32
    return %arg1, %c0_i32, %c0_i32_0 : i32, i32, i32
  }
  func.func @transform_11(%arg0: i32, %arg1: i32) -> (i32, i32, i32) {
    %c0_i32 = arith.constant 0 : i32
    %c0_i32_0 = arith.constant 0 : i32
    %c0_i32_1 = arith.constant 0 : i32
    return %arg1, %c0_i32, %c0_i32_0 : i32, i32, i32
  }
  func.func @transform_12(%arg0: i32, %arg1: i32) -> (i32, i32, i32) {
    %c0_i32 = arith.constant 0 : i32
    %c0_i32_0 = arith.constant 0 : i32
    %c0_i32_1 = arith.constant 0 : i32
    return %arg1, %c0_i32, %c0_i32_0 : i32, i32, i32
  }
  func.func @transform_13(%arg0: i32, %arg1: i32) -> (i32, i32, i32) {
    %c0_i32 = arith.constant 0 : i32
    %c0_i32_0 = arith.constant 0 : i32
    %c0_i32_1 = arith.constant 0 : i32
    return %arg1, %c0_i32, %c0_i32_0 : i32, i32, i32
  }
  func.func @transform_14(%arg0: i32, %arg1: i32) -> (i32, i32, i32) {
    %c0_i32 = arith.constant 0 : i32
    %c0_i32_0 = arith.constant 0 : i32
    %c0_i32_1 = arith.constant 0 : i32
    return %arg1, %c0_i32, %c0_i32_0 : i32, i32, i32
  }
  func.func @transform_15(%arg0: i32, %arg1: i32) -> (i32, i32, i32) {
    %c0_i32 = arith.constant 0 : i32
    %c0_i32_0 = arith.constant 0 : i32
    %c0_i32_1 = arith.constant 0 : i32
    return %arg1, %c0_i32, %c0_i32_0 : i32, i32, i32
  }
  func.func @transform_16(%arg0: i32, %arg1: i32) -> (i32, i32) {
    %c0_i32 = arith.constant 0 : i32
    %c0_i32_0 = arith.constant 0 : i32
    %c0_i32_1 = arith.constant 0 : i32
    return %c0_i32, %c0_i32_0 : i32, i32
  }
  func.func @transform_17(%arg0: i32, %arg1: i32) -> (i32, i32) {
    %c0_i32 = arith.constant 0 : i32
    %c0_i32_0 = arith.constant 0 : i32
    %c0_i32_1 = arith.constant 0 : i32
    return %c0_i32, %c0_i32_0 : i32, i32
  }
  func.func @transform_18(%arg0: i32, %arg1: i32) -> (i32, i32, i32) {
    %c0_i32 = arith.constant 0 : i32
    %c0_i32_0 = arith.constant 0 : i32
    %c0_i32_1 = arith.constant 0 : i32
    return %arg0, %c0_i32, %c0_i32_0 : i32, i32, i32
  }
}

</mosaic_0001>

<bundles_post_ra>
// kernel: bert_forward.1
= control target key start
LH: loop header
LB: loop body
LE: loop exit
PB: predicated region body
PF: predicated region fallthrough
CT: control target
= control target key end

     0   :  { %s2350_s0 = inlined_call_operand.vmem [shape: f32[16,32], index: 0, kind: input, shape index: {}]   ;;  %s2351_s1 = inlined_call_operand.vmem [shape: f32[2,1,8], index: 1, kind: input, shape index: {}]   ;;  %s2352_s2 = inlined_call_operand.vmem [shape: f32[1,32], index: 2, kind: input, shape index: {}]   ;;  %s2353_s3 = inlined_call_operand.vmem [shape: f32[1,32], index: 3, kind: input, shape index: {}]   ;;  %s2354_s4 = inlined_call_operand.vmem [shape: bf16[2,32,96], index: 4, kind: input, shape index: {}]   ;;  %s2355_s5 = inlined_call_operand.vmem [shape: f32[2,1,96], index: 5, kind: input, shape index: {}]   ;;  %s2356_s6 = inlined_call_operand.vmem [shape: bf16[2,32,32], index: 6, kind: input, shape index: {}]   ;;  %s2357_s7 = inlined_call_operand.vmem [shape: f32[2,1,32], index: 7, kind: input, shape index: {}]   ;;  %s2358_s8 = inlined_call_operand.vmem [shape: f32[2,1,32], index: 8, kind: input, shape index: {}]   ;;  %s2359_s9 = inlined_call_operand.vmem [shape: f32[2,1,32], index: 9, kind: input, shape index: {}]   ;;  %s2360_s10 = inlined_call_operand.vmem [shape: bf16[2,32,64], index: 10, kind: input, shape index: {}]   ;;  %s2361_s11 = inlined_call_operand.vmem [shape: f32[2,1,64], index: 11, kind: input, shape index: {}]   ;;  %s2362_s12 = inlined_call_operand.vmem [shape: bf16[2,64,32], index: 12, kind: input, shape index: {}]   ;;  %s2363_s13 = inlined_call_operand.vmem [shape: f32[2,1,32], index: 13, kind: input, shape index: {}]   ;;  %s2364_s14 = inlined_call_operand.vmem [shape: f32[2,1,32], index: 14, kind: input, shape index: {}]   ;;  %s2365_s15 = inlined_call_operand.vmem [shape: f32[2,1,32], index: 15, kind: input, shape index: {}]   ;;  %s2366_s16 = inlined_call_operand.vmem [shape: bf16[32,32], index: 16, kind: input, shape index: {}]   ;;  %s2367_s17 = inlined_call_operand.vmem [shape: f32[1,32], index: 17, kind: input, shape index: {}]   ;;  %s2368_s18 = inlined_call_operand.hbm [shape: f32[2,1,32], index: 18, kind: output, shape index: {}]  }
   0x1   :  { %2383 = sst [smem:[#allocation19_spill]] %s2350_s0 }
   0x2   :  { %2384 = sst [smem:[#allocation20_spill]] %s2351_s1 }
   0x3   :  { %2385 = sst [smem:[#allocation21_spill]] %s2352_s2 }
   0x4   :  { %2386 = sst [smem:[#allocation22_spill]] %s2353_s3 }
   0x5   :  { %2387 = sst [smem:[#allocation23_spill]] %s2354_s4 }
   0x6   :  { %2388 = sst [smem:[#allocation24_spill]] %s2356_s6 }
   0x7   :  { %2389 = sst [smem:[#allocation25_spill]] %s2359_s9 }
   0x8   :  { %2390 = sst [smem:[#allocation26_spill]] %s2360_s10 }
   0x9   :  { %2391 = sst [smem:[#allocation27_spill]] %s2364_s14 }
   0xa   :  { %2392 = sst [smem:[#allocation28_spill]] %s2365_s15 }
   0xb   :  { %2393 = sst [smem:[#allocation29_spill]] %s2366_s16 }
   0xc   :  { %2394 = sst [smem:[#allocation30_spill]] %s2367_s17 }
   0xd   :  { %2395 = sst [smem:[#allocation31_spill]] %s2368_s18 }
   0xe   :  { %23 = vsyncpa [#allocation5], 0 }
   0xf   :  { %25 = vsyncpa [#allocation5 + $0x1], 0  ;;  %s2028_s27 = smov 0   ;;  %s2030_s28 = smov 0  }
  0x10   :  { %s2032_s29 = smov 0   ;;  %s2034_s30 = smov 0  }
  0x11   :  { %s2036_s0 = smov 0   ;;  %s2038_s19 = smov 0  }
  0x12   :  { %s2040_s1 = smov 0   ;;  %s2042_s20 = smov 0  }
  0x13 LB: > { %2396 = sst [smem:[#allocation7_spill]] %s1887_s27  ;;  %s1598_s21 = sadd.s32 4294967295, %s1915_s20   ;;  %s1915_s20 = sphi %s2042_s20, %s31_s20   ;;  %s1911_s1 = sphi %s2040_s1, %s2448_s1   ;;  %s1907_s19 = sphi %s2038_s19, %s2447_s19   ;;  %s1903_s0 = sphi %s2036_s0, %s2446_s0   ;;  %s1899_s30 = sphi %s2034_s30, %s2445_s30   ;;  %s1895_s29 = sphi %s2032_s29, %s2444_s29   ;;  %s1891_s28 = sphi %s2030_s28, %s2450_s28   ;;  %s1887_s27 = sphi %s2028_s27, %s2449_s27  }
  0x14   : > { %2397 = sst [smem:[#allocation8_spill]] %s1895_s29  ;;  %s1599_s22 = sadd.s32 4294967294, %s1915_s20  }
  0x15   : > { %2398 = sst [smem:[#allocation9_spill]] %s1899_s30  ;;  %s40_s2 = sadd.s32 1, %s1907_s19 }
  0x16   : > { %2399 = sst [smem:[#allocation10_spill]] %s1903_s0  ;;  %p41_p0 = scmp.ge.s32.totalorder %s40_s2, 2 }
  0x17   : > { %2400 = sst [smem:[#allocation11_spill]] %s1907_s19  ;;  %s43_s23 = sadd.s32 1, %s1911_s1 }
  0x18   : > { %2401 = sst [smem:[#allocation12_spill]] %s1911_s1  ;;  %p508_p1 = scmp.ne.s32.totalorder %s1895_s29, %s1891_s28 }
  0x19   : > { %2402 = sst [smem:[#allocation13_spill]] %s1915_s20  ;;  %p509_p2 = scmp.eq.s32.totalorder %s1598_s21, 3 }
  0x1a   : > { %s2452_s2 = smov (%p41_p0, %s40_s2), 0  ;;  %s2454_s23 = smov (!%p41_p0, %s43_s23), %s1911_s1 }
  0x1b   : > { %2403 = sst [smem:[#allocation14_spill]] %s2452_s2  ;;  %p2077_p3 = por %p509_p2, %p508_p1 }
  0x1c   : > { %p514_p4 = scmp.ne.s32.totalorder %s1891_s28, %s1887_s27  ;;  %p45_p5 = scmp.ge.s32.totalorder %s2454_s23, 2 }
  0x1d   : > { %s2404_s24 = scalar_select %p2077_p3, 1, 0 }
  0x1e   : > { %p515_p6 = scmp.eq.s32.totalorder %s1599_s22, 3  ;;  %p1602_p7 = scmp.ge.s32.totalorder %s1915_s20, 1 }
  0x1f   : > { %2405 = sst [smem:[#allocation15_spill]] %s2404_s24  ;;  %p638_p8 = scmp.lt.s32.totalorder %s1915_s20, 5 }
  0x20   : > { %s2456_s23 = smov (%p45_p5, %s2454_s23), 0  ;;  %p2087_p9 = por %p515_p6, %p514_p4 }
  0x21   : > { %2406 = sst [smem:[#allocation16_spill]] %s2456_s23  ;;  %p639_p10 = pnand %p1602_p7, %p638_p8 }
  0x22   : > { %s2407_s25 = scalar_select %p2087_p9, 1, 0 }
  0x23   : > { %s495_s26 = ssub.s32 %s1911_s1, %s2456_s23  ;;  %s498_s21 = sadd.s32 1, %s1895_s29 }
  0x24   : > { %2408 = sst [smem:[#allocation17_spill]] %s2407_s25  ;;  %p496_p11 = scmp.eq.s32.totalorder %s495_s26, 0 }
  0x25   : > { %642 = sbr.rel (%p639_p10) target bundleno = 2408 (0x968), region = 92  ;;  %p737_p12 = scmp.lt.s32.totalorder (!%p639_p10), %s1903_s0, 1 }
  0x26   : > { %s2095_s2 = scalar_select %p496_p11, %s1895_s29, %s498_s21  }
  0x27   : > { %p744_p13 = scmp.lt.s32.totalorder (!%p639_p10), %s1899_s30, 1  ;;  %s2411_s27 = sld [smem:[#allocation19_spill]] (!%p639_p10) }
  0x28   : > { %2409 = sst [smem:[#allocation18_spill]] %s2095_s2  ;;  %s2418_s14 = sand.u32 (!%p639_p10), 1, %s1891_s28  }
  0x29   : > { %s2412_s4 = sld [smem:[#allocation23_spill]] (!%p639_p10)  ;;  %s2170_s15 = scalar_lea.vmem (!%p639_p10), [#allocation4], %s2418_s14 }
  0x2a   : > { %s2101_s19 = scalar_select %p737_p12, %s1903_s0, 1 }
  0x2b   : > { %s2104_s25 = scalar_select %p744_p13, %s1899_s30, 1 }
  0x2c   : > { %s1603_s26 = sshll.u32 %s2101_s19, 3  ;;  %s2413_s6 = sld [smem:[#allocation24_spill]] }
  0x2d   : > { %s740_s20 = scalar_lea.vmem %s2411_s27, %s1603_s26  ;;  %s1677_s24 = sshll.u32 %s2104_s25, 4 }
  0x2e   : > { %s2415_s10 = sld [smem:[#allocation26_spill]]  ;;  %s781_s29 = scalar_lea.vmem %s2363_s13, %s2104_s25 }
  0x2f   : > { %s2118_s17 = scalar_lea.vmem %s2412_s4, %s1677_s24  ;;  %s2416_s1 = sld [smem:[#allocation27_spill]] }
  0x30   : > { %s2419_s30 = sld [smem:[#allocation9_spill]] }
  0x32   : > { %s2127_s22 = scalar_lea.vmem %s2413_s6, %s1677_s24  ;;  %s1680_s6 = sshll.u32 %s2104_s25, 5 }
  0x33   : > { %s2158_s26 = scalar_lea.vmem %s2362_s12, %s1680_s6 }
  0x34   : > { %s2144_s16 = scalar_lea.vmem %s2415_s10, %s1677_s24  ;;  %s2417_s10 = sld [smem:[#allocation28_spill]] }
  0x35   : > { %s784_s4 = scalar_lea.vmem %s2416_s1, %s2104_s25 }
  0x36   : > { %p1612_p0 = scmp.ne.s32.totalorder %s2419_s30, 0 }
  0x37   : > { %s2420_s30 = sld [smem:[#allocation21_spill]] (!%p1612_p0) }
  0x38   : > { %792 = sbr.rel (%p1612_p0) target bundleno = 331 (0x14b), region = 96  ;;  %s2421_s23 = sld [smem:[#allocation22_spill]] (!%p1612_p0) }
  0x3a   : > { %s787_s9 = scalar_lea.vmem %s2417_s10, %s2104_s25 }
  0x3d   : > { %v793_v0 = vld [vmem:[%s740_s20] sm:$0xff]  ;;  %vm796_vm0 = vcmask 261120   ;;  %v1917_v2 = vmov 32.0  }
  0x3e   : > { %v797_v1 = vsel %vm796_vm0, %v793_v0, 0.0  ;;  %1782 = vrcp.f32 %v1917_v2  ;;  %v1780_v23 = vld [vmem:[%s2420_s30] ss:$0 sm:$0xff] }
  0x3f   : > { %798 = vadd.xlane.f32.xlu0 %v797_v1  ;;  %v1781_v25 = vld [vmem:[%s2421_s23] ss:$0 sm:$0xff] }
  0x44   : > { %v1783_v3 = vpop.eup %1782 }
  0x45   : > { %v801_v4 = vmul.f32 32.0, %v1783_v3  ;;  %vm805_vm1 = vweird.f32 %v1783_v3 }
  0x47   : > { %v802_v5 = vsub.f32 1.0, %v801_v4 }
  0x49   : > { %v803_v6 = vmul.f32 %v1783_v3, %v802_v5 }
  0x4b   : > { %v804_v7 = vadd.f32 %v1783_v3, %v803_v6 }
  0x4d   : > { %v806_v8 = vsel %vm805_vm1, %v1783_v3, %v804_v7 }
  0xb2   : > { %v799_v9 = vpop.xlane.xlu0 %798 }
  0xb3   : > { %v807_v10 = vmul.f32 %v806_v8, %v799_v9 }
  0xb5   : > { %v808_v11 = vsub.f32 %v793_v0, %v807_v10 }
  0xb7   : > { %v809_v12 = vmul.f32 %v808_v11, %v808_v11 }
  0xb9   : > { %v810_v13 = vsel %vm796_vm0, %v809_v12, 0.0 }
  0xba   : > { %811 = vadd.xlane.f32.xlu0 %v810_v13 }
 0x12d   : > { %v812_v14 = vpop.xlane.xlu0 %811 }
 0x12e   : > { %v813_v15 = vmul.f32 %v812_v14, %v806_v8 }
 0x130   : > { %v814_v16 = vadd.f32 1e-12, %v813_v15 }
 0x132   : > { %1784 = vrsqrt.f32 %v814_v16  ;;  %vm821_vm3 = vweird.f32 %v814_v16 }
 0x138   : > { %v1785_v17 = vpop.eup %1784 }
 0x139   : > { %v816_v18 = vmul.f32 %v1785_v17, %v814_v16  ;;  %vm822_vm2 = vweird.f32 %v1785_v17 }
 0x13a   : > { %vm823_vm4 = vmor %vm821_vm3, %vm822_vm2 }
 0x13b   : > { %v817_v19 = vmul.f32 %v1785_v17, %v816_v18 }
 0x13d   : > { %v818_v20 = vmul.f32 0.5, %v817_v19 }
 0x13f   : > { %v819_v21 = vsub.f32 1.5, %v818_v20 }
 0x141   : > { %v820_v22 = vmul.f32 %v1785_v17, %v819_v21 }
 0x143   : > { %v824_v24 = vsel %vm823_vm4, %v1785_v17, %v820_v22 }
 0x144   : > { %v825_v26 = vmul.f32 %v824_v24, %v808_v11 }
 0x146   : > { %v829_v27 = vmul.f32 %v1780_v23, %v825_v26 }
 0x148   : > { %v833_v28 = vadd.f32 %v1781_v25, %v829_v27 }
 0x14a   : > { %834 = vst.msk [vmem:[#allocation2] sm:$0xff] %vm796_vm0, %v833_v28 }
 0x14b PF: > { %v1682_v29 = vld [vmem:[%s2118_s17 + $0x8] sm:$0xff]  ;;  %v1681_v30 = vld [vmem:[%s2118_s17] sm:$0xff]  ;;  %vm858_vm5 = vcmask 261120   ;;  %s2422_s2 = scalar_lea.vmem %s2355_s5, %s2104_s25  ;;  %s1918_s17 = smov 104   ;;  %vm881_vm6 = vcmask 64512   ;;  %vm923_vm7 = vcmask 1043456  }
 0x14c   : > { %868 = vmatpush.bf16.msra.mxu0 %v1682_v29  ;;  %v1786_v33 = vld [vmem:[%s2422_s2] ss:$0 sm:$0xff]  ;;  %s1919_s18 = smov 120   ;;  %s1920_s0 = smov 96   ;;  %vm941_vm8 = vcmask 60416   ;;  %vm1006_vm9 = vcmask 126016  }
 0x14d   : > { %s1921_s24 = smov 80   ;;  %s1922_s3 = smov 72   ;;  %vm1071_vm10 = vcmask 191616   ;;  %vm1136_vm11 = vcmask 257216   ;;  %vm1298_vm0 = vcmask 523264  }
 0x14e   : > { %s1923_s14 = smov 88   ;;  %s1924_s6 = smov 112  }
 0x14f   : > { %s2423_s1 = sld [smem:[#allocation20_spill]]  ;;  %s1926_s23 = smov 40  }
 0x150   : > { %869 = vmatpush.bf16.msra.mxu0 %v1681_v30  ;;  %s1927_s21 = smov 56   ;;  %s1928_s27 = smov 48  }
 0x151   : > { %v2184_v31 = vld [vmem:[#allocation2] sm:$0xff]  ;;  %s1929_s2 = smov 8   ;;  %s2427_s30 = sld [smem:[#allocation25_spill]] }
 0x152   : > { %v836_v32 = vpack.c.bf16 %v2184_v31, %v2184_v31 }
 0x154   : > { %1621 = vmatmul.msk.bf16.vlgmr.msra.gmra.mxu0 %vm858_vm5, %v836_v32 }
 0x155   : > { %s2424_s20 = scalar_lea.vmem %s2423_s1, %s2101_s19  ;;  %s1925_s19 = smov 64  }
 0x156   : > { %v1787_v51 = vld [vmem:[%s2424_s20] ss:$0 sm:$0xff] }
 0x157   : > { %s2428_s1 = scalar_lea.vmem %s2427_s30, %s2104_s25 }
 0x1d1   : > { %v871_v34 = vpop.f32.mrf.mxu0 }
 0x1d2   : > { %v872_v35 = vadd.f32 %v1786_v33, %v871_v34 }
 0x1d4   : > { %v875_v36 = vpack.c.bf16 %v872_v35, %v872_v35 }
 0x1d6   : > { %v877_v37 = vunpack.c.l.b16 %v875_v36 }
 0x1d8   : > { %v2194_v38 = vpack.c.b16 %v877_v37, %v877_v37 }
 0x1d9   : > { %v873_v39 = vpop.f32.mrf.mxu0 }
 0x1da   : > { %1073 = vrot.lane.b32.xlu2 %v2194_v38, %s1918_s17  ;;  %943 = vrot.lane.b32.xlu1 %v2194_v38, %s1919_s18  ;;  %s1930_s17 = smov 16   ;;  %s1931_s18 = smov 24  }
 0x1db   : > { %879 = vrot.lane.b32.xlu0 %v2194_v38, %s1920_s0 }
 0x1e2   : > { %1010 = vrot.lane.b32.xlu2 %v2194_v38, %s1921_s24  ;;  %1075 = vrot.lane.b32.xlu1 %v2194_v38, %s1922_s3  ;;  %s2425_s3 = scalar_lea.vmem %s2357_s7, %s2104_s25  ;;  %s2432_s24 = sld [smem:[#allocation9_spill]] }
 0x1e3   : > { %945 = vrot.lane.b32.xlu0 %v2194_v38, %s1923_s14  ;;  %s2426_s14 = scalar_lea.vmem %s2358_s8, %s2104_s25 }
 0x1e8   : > { %p1665_p1 = scmp.ne.s32.totalorder %s2432_s24, 1 }
 0x1eb   : > { %1008 = vrot.lane.b32.xlu0 %v2194_v38, %s1924_s6  ;;  %s2434_s6 = sld [smem:[#allocation30_spill]] (!%p1665_p1) }
 0x234   : > { %v1074_v40 = vpop.permute.xlu2 %1073 }
 0x23c   : > { %v1011_v41 = vpop.permute.xlu2 %1010 }
 0x23d   : > { %v1016_v42 = vsel %vm881_vm6, %v1011_v41, 0 }
 0x23e   : > { %1025 = vmatpush.bf16.xpose.msrb.mxu0 %v1016_v42 }
 0x24c   : > { %v944_v43 = vpop.permute.xlu1 %943 }
 0x24d   : > { %v880_v44 = vpop.permute.xlu0 %879 }
 0x24e   : > { %v886_v45 = vsel %vm881_vm6, %v880_v44, 0 }
 0x24f   : > { %895 = vmatpush.bf16.xpose.msra.mxu1 %v886_v45 }
 0x254   : > { %v1076_v46 = vpop.permute.xlu1 %1075 }
 0x255   : > { %v946_v47 = vpop.permute.xlu0 %945  ;;  %v1081_v48 = vsel %vm881_vm6, %v1076_v46, 0 }
 0x256   : > { %1622 = vmatmul.msk.bf16.vlgmr.msra.gmra.mxu1 %vm881_vm6, %v875_v36  ;;  %v951_v49 = vsel %vm881_vm6, %v946_v47, 0 }
 0x257   : > { %960 = vmatpush.bf16.xpose.msra.mxu3 %v951_v49 }
 0x25d   : > { %v1009_v50 = vpop.permute.xlu0 %1008 }
 0x25e   : > { %1624 = vmatmul.msk.bf16.vlgmr.msra.gmra.mxu3 %vm881_vm6, %v944_v43  ;;  %1626 = vmatmul.msk.bf16.vlgmr.msrb.gmra.mxu0 %vm881_vm6, %v1009_v50 }
 0x25f   : > { %1090 = vmatpush.bf16.xpose.msrb.mxu3 %v1081_v48 }
 0x26e   : > { %1628 = vmatmul.msk.bf16.vlgmr.msrb.gmra.mxu3 %vm881_vm6, %v1074_v40 }
 0x2d3   : > { %v897_v52 = vpop.f32.mrf.mxu1 }
 0x2d4   : > { %v901_v53 = vmul.f32 0.35355338, %v897_v52 }
 0x2d6   : > { %v905_v54 = vadd.f32 %v1787_v51, %v901_v53 }
 0x2d8   : > { %v906_v55 = vsel %vm881_vm6, %v905_v54, -inf }
 0x2d9   : > { %907 = vmax.xlane.f32.xlu1 %v906_v55 }
 0x2db   : > { %v899_v56 = vpop.f32.mrf.mxu1  ;;  %v1027_v57 = vpop.f32.mrf.mxu0 }
 0x2dc   : > { %v1031_v62 = vmul.f32 0.35355338, %v1027_v57 }
 0x2de   : > { %v1032_v1 = vadd.f32 %v1787_v51, %v1031_v62 }
 0x2e0   : > { %v1033_v2 = vsel %vm881_vm6, %v1032_v1, -inf }
 0x2e1   : > { %v962_v58 = vpop.f32.mrf.mxu3 }
 0x2e2   : > { %v966_v59 = vmul.f32 0.35355338, %v962_v58 }
 0x2e3   : > { %v1029_v60 = vpop.f32.mrf.mxu0 }
 0x2e4   : > { %v967_v61 = vadd.f32 %v1787_v51, %v966_v59 }
 0x2e6   : > { %v968_v63 = vsel %vm881_vm6, %v967_v61, -inf }
 0x2e7   : > { %969 = vmax.xlane.f32.xlu2 %v968_v63 }
 0x2e9   : > { %v964_v0 = vpop.f32.mrf.mxu3 }
 0x2ef   : > { %1034 = vmax.xlane.f32.xlu2 %v1033_v2  ;;  %v1683_v2 = vld [vmem:[%s2127_s22] sm:$0xff] }
 0x2f1   : > { %v1092_v3 = vpop.f32.mrf.mxu3 }
 0x2f2   : > { %v1096_v4 = vmul.f32 0.35355338, %v1092_v3 }
 0x2f4   : > { %v1097_v5 = vadd.f32 %v1787_v51, %v1096_v4 }
 0x2f6   : > { %v1098_v6 = vsel %vm881_vm6, %v1097_v5, -inf }
 0x2f7   : > { %1099 = vmax.xlane.f32.xlu0 %v1098_v6 }
 0x2f9   : > { %v1094_v7 = vpop.f32.mrf.mxu3 }
 0x2fa   : > { %v1788_v7 = vld [vmem:[%s2425_s3] ss:$0 sm:$0xff] }
 0x307   : > { %918 = vrot.lane.b32.xlu2 %v2194_v38, %s1925_s19 }
 0x30f   : > { %1110 = vrot.lane.b32.xlu2 %v2194_v38, %s1926_s23  ;;  %s2429_s23 = scalar_lea.vmem %s2361_s11, %s2104_s25 }
 0x34c   : > { %v908_v8 = vpop.xlane.xlu1 %907 }
 0x34d   : > { %v909_v9 = vsub.f32 %v905_v54, %v908_v8 }
 0x34f   : > { %v910_v10 = vmul.f32 1.442695, %v909_v9 }
 0x351   : > { %1795 = vpow2.f32 %v910_v10 }
 0x357   : > { %v1796_v11 = vpop.eup %1795 }
 0x358   : > { %v912_v12 = vsel %vm881_vm6, %v1796_v11, 0.0 }
 0x359   : > { %913 = vadd.xlane.f32.xlu1 %v912_v12 }
 0x35a   : > { %v970_v13 = vpop.xlane.xlu2 %969 }
 0x35b   : > { %v971_v16 = vsub.f32 %v967_v61, %v970_v13  ;;  %v1932_v13 = vmov 32.0  }
 0x35d   : > { %v972_v18 = vmul.f32 1.442695, %v971_v16 }
 0x362   : > { %v1035_v14 = vpop.xlane.xlu2 %1034 }
 0x363   : > { %v1036_v15 = vsub.f32 %v1032_v1, %v1035_v14  ;;  %v1684_v1 = vld [vmem:[%s2127_s22 + $0x8] sm:$0xff] }
 0x364   : > { %1168 = vmatpush.bf16.msra.mxu0 %v1684_v1 }
 0x365   : > { %v1037_v17 = vmul.f32 1.442695, %v1036_v15 }
 0x367   : > { %1797 = vpow2.f32 %v1037_v17 }
 0x368   : > { %1799 = vpow2.f32 %v972_v18  ;;  %1169 = vmatpush.bf16.msra.mxu0 %v1683_v2 }
 0x36a   : > { %v919_v19 = vpop.permute.xlu2 %918  ;;  %v1100_v20 = vpop.xlane.xlu0 %1099 }
 0x36b   : > { %v925_v21 = vsel %vm923_vm7, %v919_v19, 0  ;;  %v1101_v23 = vsub.f32 %v1097_v5, %v1100_v20 }
 0x36c   : > { %934 = vmatpush.bf16.msra.mxu2 %v925_v21 }
 0x36d   : > { %v1798_v22 = vpop.eup %1797  ;;  %v1102_v25 = vmul.f32 1.442695, %v1101_v23 }
 0x36e   : > { %v1039_v24 = vsel %vm881_vm6, %v1798_v22, 0.0  ;;  %v1800_v26 = vpop.eup %1799 }
 0x36f   : > { %1040 = vadd.xlane.f32.xlu0 %v1039_v24  ;;  %1801 = vpow2.f32 %v1102_v25  ;;  %v974_v27 = vsel %vm881_vm6, %v1800_v26, 0.0  ;;  %v1686_v24 = vld [vmem:[%s2144_s16 + $0x8] sm:$0xff]  ;;  %v1685_v25 = vld [vmem:[%s2144_s16] sm:$0xff]  ;;  %s2433_s16 = sld [smem:[#allocation29_spill]] (!%p1665_p1) }
 0x372   : > { %980 = vrot.lane.b32.xlu1 %v2194_v38, %s1927_s21  ;;  %v1111_v36 = vpop.permute.xlu2 %1110 }
 0x373   : > { %v1116_v40 = vsel %vm923_vm7, %v1111_v36, 0  ;;  %v1789_v36 = vld [vmem:[%s2426_s14] ss:$0 sm:$0xff] }
 0x375   : > { %v1802_v28 = vpop.eup %1801 }
 0x376   : > { %v1104_v29 = vsel %vm881_vm6, %v1802_v28, 0.0 }
 0x377   : > { %975 = vadd.xlane.f32.xlu0 %v974_v27 }
 0x37f   : > { %1105 = vadd.xlane.f32.xlu0 %v1104_v29 }
 0x393   : > { %1045 = vrot.lane.b32.xlu0 %v2194_v38, %s1928_s27 }
 0x3cc   : > { %v914_v30 = vpop.xlane.xlu1 %913 }
 0x3cd   : > { %1803 = vrcp.f32 %v914_v30 }
 0x3d3   : > { %v1804_v32 = vpop.eup %1803 }
 0x3d4   : > { %v916_v33 = vmul.f32 %v1804_v32, %v1796_v11 }
 0x3d6   : > { %v917_v34 = vpack.c.bf16 %v916_v33, %v916_v33 }
 0x3d8   : > { %1623 = vmatmul.msk.bf16.vlgmr.msra.gmra.mxu2 %vm881_vm6, %v917_v34 }
 0x3e2   : > { %v1041_v35 = vpop.xlane.xlu0 %1040 }
 0x3e4   : > { %v981_v37 = vpop.permute.xlu1 %980 }
 0x3e5   : > { %v986_v39 = vsel %vm923_vm7, %v981_v37, 0 }
 0x3e6   : > { %995 = vmatpush.bf16.msrb.mxu2 %v986_v39  ;;  %v1790_v39 = vld [vmem:[%s2428_s1] ss:$0 sm:$0xff] }
 0x3ea   : > { %1125 = vmatpush.bf16.msra.mxu2 %v1116_v40  ;;  %v976_v41 = vpop.xlane.xlu0 %975 }
 0x3eb   : > { %1805 = vrcp.f32 %v976_v41 }
 0x3f1   : > { %v1806_v42 = vpop.eup %1805 }
 0x3f2   : > { %v978_v38 = vmul.f32 %v1806_v42, %v1800_v26  ;;  %v1106_v43 = vpop.xlane.xlu0 %1105 }
 0x3f3   : > { %1807 = vrcp.f32 %v1106_v43  ;;  %v1690_v43 = vld [vmem:[%s2158_s26 + $0x18] sm:$0xff] }
 0x3f4   : > { %v979_v44 = vpack.c.bf16 %v978_v38, %v978_v38  ;;  %1809 = vrcp.f32 %v1041_v35  ;;  %1306 = vmatpush.bf16.msra.mxu3 %v1690_v43 }
 0x3f5   : > { %1811 = vrcp.f32 %v1932_v13 }
 0x3f6   : > { %1625 = vmatmul.msk.bf16.vlgmr.msrb.gmra.mxu2 %vm881_vm6, %v979_v44  ;;  %v1689_v44 = vld [vmem:[%s2158_s26 + $0x10] sm:$0xff] }
 0x3f8   : > { %1307 = vmatpush.bf16.msra.mxu3 %v1689_v44 }
 0x3f9   : > { %v1808_v45 = vpop.eup %1807 }
 0x3fa   : > { %v1108_v46 = vmul.f32 %v1808_v45, %v1802_v28  ;;  %v1810_v47 = vpop.eup %1809  ;;  %v1688_v45 = vld [vmem:[%s2158_s26 + $0x8] sm:$0xff] }
 0x3fb   : > { %v1043_v48 = vmul.f32 %v1810_v47, %v1798_v22  ;;  %v1812_v14 = vpop.eup %1811  ;;  %v1791_v47 = vld [vmem:[%s2429_s23] ss:$0 sm:$0xff] }
 0x3fc   : > { %v1109_v49 = vpack.c.bf16 %v1108_v46, %v1108_v46  ;;  %v1182_v15 = vmul.f32 32.0, %v1812_v14  ;;  %vm1186_vm12 = vweird.f32 %v1812_v14  ;;  %1308 = vmatpush.bf16.msra.mxu3 %v1688_v45  ;;  %v1687_v46 = vld [vmem:[%s2158_s26] sm:$0xff] }
 0x3fd   : > { %v1044_v52 = vpack.c.bf16 %v1043_v48, %v1043_v48 }
 0x3fe   : > { %v1183_v16 = vsub.f32 1.0, %v1182_v15 }
 0x400   : > { %v1184_v17 = vmul.f32 %v1812_v14, %v1183_v16  ;;  %1309 = vmatpush.bf16.msra.mxu3 %v1687_v46 }
 0x402   : > { %v1185_v18 = vadd.f32 %v1812_v14, %v1184_v17  ;;  %v1793_v17 = vld [vmem:[%s784_s4] ss:$0 sm:$0xff] }
 0x404   : > { %v2246_v19 = vsel %vm1186_vm12, %v1812_v14, %v1185_v18 }
 0x405   : > { %v1046_v50 = vpop.permute.xlu0 %1045 }
 0x406   : > { %1629 = vmatmul.msk.bf16.vlgmr.msra.gmra.mxu2 %vm881_vm6, %v1109_v49  ;;  %v1051_v51 = vsel %vm923_vm7, %v1046_v50, 0 }
 0x407   : > { %1060 = vmatpush.bf16.msrb.mxu1 %v1051_v51 }
 0x40a   : > { %1627 = vmatmul.msk.bf16.vlgmr.msrb.gmra.mxu1 %vm881_vm6, %v1044_v52 }
 0x40b   : > { %1245 = vmatpush.bf16.msra.mxu1 %v1686_v24 }
 0x40f   : > { %1246 = vmatpush.bf16.msra.mxu1 %v1685_v25 }
 0x45b   : > { %v936_v53 = vpop.f32.mrf.mxu2 }
 0x45c   : > { %v940_v54 = vpack.c.bf16 %v936_v53, %v936_v53 }
 0x45e   : > { %942 = vst.msk [vmem:[#allocation3] sm:$0xf] %vm941_vm8, %v940_v54 }
 0x463   : > { %v938_v55 = vpop.f32.mrf.mxu2 }
 0x479   : > { %v997_v56 = vpop.f32.mrf.mxu2 }
 0x47a   : > { %v1001_v57 = vpack.c.bf16 %v997_v56, %v997_v56 }
 0x47c   : > { %1003 = vrot.lane.b32.xlu1 %v1001_v57, %s1929_s2 }
 0x481   : > { %v999_v58 = vpop.f32.mrf.mxu2 }
 0x487   : > { %v1062_v59 = vpop.f32.mrf.mxu1 }
 0x488   : > { %v1066_v60 = vpack.c.bf16 %v1062_v59, %v1062_v59 }
 0x489   : > { %v1127_v61 = vpop.f32.mrf.mxu2 }
 0x48a   : > { %v1131_v62 = vpack.c.bf16 %v1127_v61, %v1127_v61  ;;  %1068 = vrot.lane.b32.xlu2 %v1066_v60, %s1930_s17  ;;  %v1792_v61 = vld [vmem:[%s781_s29] ss:$0 sm:$0xff] }
 0x48c   : > { %1133 = vrot.lane.b32.xlu1 %v1131_v62, %s1931_s18 }
 0x48f   : > { %v1064_v63 = vpop.f32.mrf.mxu1 }
 0x491   : > { %v1129_v0 = vpop.f32.mrf.mxu2 }
 0x4e4   : > { %v1069_v4 = vpop.permute.xlu2 %1068 }
 0x4ee   : > { %v1004_v3 = vpop.permute.xlu1 %1003 }
 0x4ef   : > { %1007 = vst.msk [vmem:[#allocation3] sm:$0xf] %vm1006_vm9, %v1004_v3 }
 0x4f0   : > { %1072 = vst.msk [vmem:[#allocation3] sm:$0xf] %vm1071_vm10, %v1069_v4 }
 0x4fe   : > { %v1134_v5 = vpop.permute.xlu1 %1133 }
 0x4ff   : > { %1137 = vst.msk [vmem:[#allocation3] sm:$0xf] %vm1136_vm11, %v1134_v5 }
 0x506   : > { %v1138_v6 = vld [vmem:[#allocation3] sm:$0xf] }
 0x507   : > { %1638 = vmatmul.msk.bf16.vlgmr.msra.gmra.mxu0 %vm858_vm5, %v1138_v6 }
 0x584   : > { %v1171_v8 = vpop.f32.mrf.mxu0 }
 0x585   : > { %v1172_v9 = vadd.f32 %v1788_v7, %v1171_v8 }
 0x587   : > { %v1175_v10 = vadd.f32 %v1172_v9, %v2184_v31 }
 0x589   : > { %v1178_v11 = vsel %vm858_vm5, %v1175_v10, 0.0 }
 0x58a   : > { %1179 = vadd.xlane.f32.xlu2 %v1178_v11 }
 0x58c   : > { %v1173_v12 = vpop.f32.mrf.mxu0 }
 0x5fd   : > { %v1180_v20 = vpop.xlane.xlu2 %1179 }
 0x5fe   : > { %v1188_v21 = vmul.f32 %v2246_v19, %v1180_v20 }
 0x600   : > { %v1189_v31 = vsub.f32 %v1175_v10, %v1188_v21 }
 0x602   : > { %v1190_v22 = vmul.f32 %v1189_v31, %v1189_v31 }
 0x604   : > { %v1191_v23 = vsel %vm858_vm5, %v1190_v22, 0.0 }
 0x605   : > { %1192 = vadd.xlane.f32.xlu1 %v1191_v23 }
 0x678   : > { %v1193_v26 = vpop.xlane.xlu1 %1192 }
 0x679   : > { %v1194_v27 = vmul.f32 %v1193_v26, %v2246_v19 }
 0x67b   : > { %v1195_v28 = vadd.f32 1e-12, %v1194_v27 }
 0x67d   : > { %1813 = vrsqrt.f32 %v1195_v28  ;;  %vm1202_vm14 = vweird.f32 %v1195_v28 }
 0x683   : > { %v1814_v29 = vpop.eup %1813 }
 0x684   : > { %v1197_v30 = vmul.f32 %v1814_v29, %v1195_v28  ;;  %vm1203_vm13 = vweird.f32 %v1814_v29 }
 0x685   : > { %vm1204_vm15 = vmor %vm1202_vm14, %vm1203_vm13 }
 0x686   : > { %v1198_v32 = vmul.f32 %v1814_v29, %v1197_v30 }
 0x688   : > { %v1199_v33 = vmul.f32 0.5, %v1198_v32 }
 0x68a   : > { %v1200_v34 = vsub.f32 1.5, %v1199_v33 }
 0x68c   : > { %v1201_v35 = vmul.f32 %v1814_v29, %v1200_v34 }
 0x68e   : > { %v1205_v37 = vsel %vm1204_vm15, %v1814_v29, %v1201_v35 }
 0x68f   : > { %v1206_v40 = vmul.f32 %v1205_v37, %v1189_v31 }
 0x691   : > { %v1210_v41 = vmul.f32 %v1789_v36, %v1206_v40 }
 0x693   : > { %v1214_v42 = vadd.f32 %v1790_v39, %v1210_v41 }
 0x695   : > { %v1215_v38 = vpack.c.bf16 %v1214_v42, %v1214_v42 }
 0x697   : > { %1647 = vmatmul.msk.bf16.vlgmr.msra.gmra.mxu1 %vm858_vm5, %v1215_v38 }
 0x714   : > { %v1248_v48 = vpop.f32.mrf.mxu1 }
 0x715   : > { %v1249_v49 = vadd.f32 %v1791_v47, %v1248_v48 }
 0x717   : > { %v1253_v50 = vmul.f32 0.044715, %v1249_v49  ;;  %v1252_v57 = vmul.f32 0.5, %v1249_v49 }
 0x719   : > { %v1254_v51 = vmul.f32 %v1253_v50, %v1249_v49 }
 0x71b   : > { %v1255_v52 = vmul.f32 %v1254_v51, %v1249_v49 }
 0x71c   : > { %v1250_v53 = vpop.f32.mrf.mxu1 }
 0x71d   : > { %v1256_v54 = vadd.f32 %v1255_v52, %v1249_v49 }
 0x71f   : > { %v1257_v55 = vmul.f32 0.7978846, %v1256_v54 }
 0x721   : > { %1815 = vtanh.f32 %v1257_v55 }
 0x727   : > { %v1816_v56 = vpop.eup %1815 }
 0x728   : > { %v1259_v58 = vadd.f32 1.0, %v1816_v56 }
 0x72a   : > { %v1260_v59 = vmul.f32 %v1259_v58, %v1252_v57 }
 0x72c   : > { %v1261_v60 = vpack.c.bf16 %v1260_v59, %v1260_v59 }
 0x72e   : > { %1664 = vmatmul.msk.bf16.vlgmr.msra.gmra.mxu3 %vm1298_vm0, %v1261_v60 }
 0x7b1   : > { %v1311_v62 = vpop.f32.mrf.mxu3 }
 0x7b2   : > { %v1312_v63 = vadd.f32 %v1792_v61, %v1311_v62 }
 0x7b4   : > { %v1315_v0 = vadd.f32 %v1312_v63, %v1214_v42 }
 0x7b6   : > { %v1318_v1 = vsel %vm858_vm5, %v1315_v0, 0.0 }
 0x7b7   : > { %1319 = vadd.xlane.f32.xlu0 %v1318_v1 }
 0x7b9   : > { %v1313_v2 = vpop.f32.mrf.mxu3 }
 0x82a   : > { %v1320_v3 = vpop.xlane.xlu0 %1319 }
 0x82b   : > { %v1321_v4 = vmul.f32 %v1320_v3, %v2246_v19 }
 0x82d   : > { %v1322_v5 = vsub.f32 %v1315_v0, %v1321_v4 }
 0x82f   : > { %v1323_v6 = vmul.f32 %v1322_v5, %v1322_v5 }
 0x831   : > { %v1324_v7 = vsel %vm858_vm5, %v1323_v6, 0.0 }
 0x832   : > { %1325 = vadd.xlane.f32.xlu2 %v1324_v7 }
 0x8a5   : > { %v1326_v8 = vpop.xlane.xlu2 %1325 }
 0x8a6   : > { %v1327_v9 = vmul.f32 %v1326_v8, %v2246_v19  ;;  %v1794_v19 = vld [vmem:[%s787_s9] ss:$0 sm:$0xff] }
 0x8a8   : > { %v1328_v10 = vadd.f32 1e-12, %v1327_v9 }
 0x8aa   : > { %1817 = vrsqrt.f32 %v1328_v10  ;;  %vm1335_vm2 = vweird.f32 %v1328_v10 }
 0x8b0   : > { %v1818_v11 = vpop.eup %1817 }
 0x8b1   : > { %v1330_v12 = vmul.f32 %v1818_v11, %v1328_v10  ;;  %vm1336_vm1 = vweird.f32 %v1818_v11 }
 0x8b2   : > { %vm1337_vm3 = vmor %vm1335_vm2, %vm1336_vm1 }
 0x8b3   : > { %v1331_v13 = vmul.f32 %v1818_v11, %v1330_v12 }
 0x8b5   : > { %v1332_v14 = vmul.f32 0.5, %v1331_v13 }
 0x8b7   : > { %v1333_v15 = vsub.f32 1.5, %v1332_v14 }
 0x8b9   : > { %v1334_v16 = vmul.f32 %v1818_v11, %v1333_v15 }
 0x8bb   : > { %v1338_v18 = vsel %vm1337_vm3, %v1818_v11, %v1334_v16 }
 0x8bc   : > { %v1339_v20 = vmul.f32 %v1338_v18, %v1322_v5 }
 0x8be   : > { %v1343_v21 = vmul.f32 %v1793_v17, %v1339_v20  ;;  %1352 = sbr.rel (%p1665_p1) target bundleno = 2387 (0x953), region = 100 }
 0x8c0   : > { %v1347_v31 = vadd.f32 %v1794_v19, %v1343_v21 }
 0x8c2   : > { %1348 = vst.msk [vmem:[#allocation2] sm:$0xff] %vm858_vm5, %v1347_v31 }
 0x8c3   : > { %v1692_v22 = vld [vmem:[%s2433_s16 + $0x8] sm:$0xff]  ;;  %v1691_v23 = vld [vmem:[%s2433_s16] sm:$0xff]  ;;  %v1353_v24 = vpack.c.bf16 %v1347_v31, %v1347_v31  ;;  %vm1388_vm4 = vcmask 253952  }
 0x8c4   : > { %1380 = vmatpush.bf16.msra.mxu0 %v1692_v22  ;;  %v1358_v25 = vld [vmem:[%s2434_s6] sm:$0x1] }
 0x8c8   : > { %1381 = vmatpush.bf16.msra.mxu0 %v1691_v23 }
 0x8cb   : > { %1674 = vmatmul.msk.bf16.vlgmr.msra.gmra.mxu0 %vm858_vm5, %v1353_v24 }
 0x948   : > { %v1383_v26 = vpop.f32.mrf.mxu0 }
 0x949   : > { %v1384_v27 = vadd.f32 %v1383_v26, %v1358_v25 }
 0x94b   : > { %1819 = vtanh.f32 %v1384_v27 }
 0x950   : > { %v1385_v28 = vpop.f32.mrf.mxu0 }
 0x951   : > { %v1820_v29 = vpop.eup %1819 }
 0x952   : > { %1389 = vst.msk [vmem:[%s2170_s15] sm:$0x1] %vm1388_vm4, %v1820_v29 }
 0x953 PF: > { %s2435_s10 = sld [smem:[#allocation10_spill]]  ;;  %s1401_s21 = sshll.u32 %s2170_s15, 4  ;;  %s1402_s21 = int_to_ptr.vmem [resolvable:$true] %s1401_s21 }
 0x954   : > { %s2436_s20 = sld [smem:[#allocation31_spill]]  ;;  %s2439_s27 = sand.u32 1, %s1891_s28  }
 0x955   : > { %s1391_s2 = scalar_lea.sflag [#allocation5], %s2439_s27 }
 0x95a   : > { %s2437_s23 = smov %s2436_s20  ;;  %s1399_s26 = scalar_lea.hbm %s2436_s20, %s2435_s10 }
 0x95b   : > { %s1403_s29 = sshll.u32 %s1399_s26, 4  ;;  %s1841_s3 = scalar_lea.hbm %s2437_s23, 2  ;;  %s1404_s29 = int_to_ptr.hbm [resolvable:$true] %s1403_s29 }
 0x95c   : > { %s1835_s17 = sshra.s32 %s1404_s29, 4  ;;  %s1836_s17 = int_to_ptr.hbm [resolvable:$true] %s1835_s17 }
 0x95d   : > { %s1837_s18 = scalar_lea.hbm %s1836_s17, 1  ;;  %p1842_p6 = scmp.lt.s32.totalorder %s1836_s17, %s2437_s23 }
 0x95e   : > { %p1838_p2 = scmp.ne.s32.totalorder %s1836_s17, %s1837_s18  ;;  %p1843_p7 = scmp.lt.s32.totalorder %s1841_s3, %s1837_s18 }
 0x960   : > { %p1839_p4 = pnand %p1838_p2, %p2077_p3  ;;  %p1844_p8 = por %p1843_p7, %p1842_p6 }
 0x962   : > { %p1840_p5 = pneg %p1839_p4 }
 0x964   : > { %p1845_p10 = pnand %p1844_p8, %p1840_p5 }
 0x966   : > { %1848 = shalt.err (!%p1845_p10)
}
 0x967   : > { %1693 = dma.vmem_to_hbm [thread:$0]  (%p2077_p3), %s1402_s21, 16, %s1404_s29, %s1391_s2  }
 0x968 PF: > { %s2440_s15 = sld [smem:[#allocation13_spill]] }
 0x969   : > { %s2441_s14 = sld [smem:[#allocation7_spill]] }
 0x96e   : > { %p1699_p11 = scmp.ge.s32.totalorder %s2440_s15, 2 }
 0x96f   : > { %s1415_s25 = sand.u32 1, %s2441_s14  }
 0x970   : > { %p1696_p12 = pnand %p1699_p11, %p2087_p9  ;;  %s1416_s6 = scalar_lea.sflag [#allocation5], %s1415_s25 }
 0x972   : > { %p1697_p13 = pneg %p1696_p12 }
 0x974   : > { %1882 = dma.done.wait (%p1697_p13), %s1416_s6, 16  }
 0x975   : > { %1884 = vsyncadd (%p1697_p13), %s1416_s6, 4294967280  ;;  %s31_s20 = sadd.s32 1, %s2440_s15   ;;  %s2443_s10 = sld [smem:[#allocation8_spill]] }
 0x976   : > { %p28_p0 = scmp.ge.s32.totalorder %s31_s20, 6   ;;  %s2444_s29 = sld [smem:[#allocation18_spill]] }
 0x977   : > { %s2445_s30 = sld [smem:[#allocation11_spill]]  ;;  %s2449_s27 = smov %s1891_s28 }
 0x978   : > { %s2446_s0 = sld [smem:[#allocation12_spill]]  ;;  %30 = sbr.rel (!%p28_p0) target bundleno = 19 (0x13), region = 174 }
 0x979   : > { %s2447_s19 = sld [smem:[#allocation14_spill]] }
 0x97a   : > { %s2448_s1 = sld [smem:[#allocation16_spill]] }
 0x97b   : > { %s2450_s28 = smov %s2443_s10 }
 0x97d   :  { %1421 = vsyncpa [#allocation5], 1 }
 0x97e   :  { %1423 = vsyncpa [#allocation5 + $0x1], 1 }

</bundles_post_ra>
